<compile_context>
chip_gen: v5e
topology: v5e:2x2
jax: 0.10.0
libtpu: 0.0.40
codegen_flags: <defaults>
</compile_context>

<pallas_src>
import math

import jax
import jax.numpy as jnp
from jax import lax
from jax.experimental import pallas as pl
from jax.experimental.pallas import tpu as pltpu

B, S, D, H = 2, 8, 32, 4          # batch, seq, model dim, heads
DH = D // H                       # per-head dim (dim_q = dim_k = dim_v)
FF = 64                           # feed-forward hidden dim (small stand-in for 2048)
LN_EPS = 1e-5                     # nn.LayerNorm default


def decoder_layer_kernel(
    tgt_ref, mem_ref, mask_ref,
    wqkv1_ref, bqkv1_ref, wo1_ref, bo1_ref, g1_ref, be1_ref,
    wq2_ref, bq2_ref, wkv2_ref, bkv2_ref, wo2_ref, bo2_ref, g2_ref, be2_ref,
    w1_ref, b1_ref, w2_ref, b2_ref, g3_ref, be3_ref,
    o_ref,
):
    """One batch element per grid step; full decoder layer fused."""
    x = tgt_ref[0]          # (S, D) float32
    mem = mem_ref[0]        # (S, D)
    amask = mask_ref[0]     # (S, S) additive mask

    def layer_norm(v, gamma, beta):
        mu = jnp.mean(v, axis=-1, keepdims=True)
        c = v - mu
        var = jnp.mean(c * c, axis=-1, keepdims=True)
        return c * lax.rsqrt(var + LN_EPS) * gamma + beta

    def mha(q_heads, k_heads, v_heads, add_mask, wo, bo):
        # q/k/v_heads: (H, S, DH); 1/sqrt(DH) already folded into the q weights.
        s = jnp.einsum("hqd,hkd->hqk", q_heads, k_heads,
                       preferred_element_type=jnp.float32)        # (H, S, S)
        if add_mask is not None:
            s = s + add_mask[None]                                 # additive mask
        m = jnp.max(s, axis=-1, keepdims=True)
        p = jnp.exp(s - m)
        denom = jnp.sum(p, axis=-1, keepdims=True)
        p = p * pl.reciprocal(denom, approx=True)                  # EUP slot (~free)
        ctx = jnp.einsum("hqk,hkd->hqd", p, v_heads,
                         preferred_element_type=jnp.float32)       # (H, S, DH)
        # Per-head slice of the output projection, summed over heads:
        # avoids the H-way lane concatenation of head outputs.
        out = jnp.einsum("hqd,hdf->hqf", ctx, wo,
                         preferred_element_type=jnp.float32)       # (H, S, D)
        return jnp.sum(out, axis=0) + bo                           # (S, D)

    # ---- sublayer 1: masked self-attention + residual + LayerNorm ----------
    xb = jnp.broadcast_to(x, (H, S, D))
    qkv = jnp.einsum("hsd,hde->hse", xb, wqkv1_ref[...],
                     preferred_element_type=jnp.float32) + bqkv1_ref[...]
    attn1 = mha(qkv[:, :, 0:DH], qkv[:, :, DH:2 * DH], qkv[:, :, 2 * DH:3 * DH],
                amask, wo1_ref[...], bo1_ref[...])
    x = layer_norm(x + attn1, g1_ref[...], be1_ref[...])           # dropout = identity

    # ---- sublayer 2: cross-attention over memory (mask=None) ---------------
    xb = jnp.broadcast_to(x, (H, S, D))
    qh = jnp.einsum("hsd,hde->hse", xb, wq2_ref[...],
                    preferred_element_type=jnp.float32) + bq2_ref[...]
    memb = jnp.broadcast_to(mem, (H, S, D))
    kv = jnp.einsum("hsd,hde->hse", memb, wkv2_ref[...],
                    preferred_element_type=jnp.float32) + bkv2_ref[...]
    attn2 = mha(qh, kv[:, :, 0:DH], kv[:, :, DH:2 * DH],
                None, wo2_ref[...], bo2_ref[...])
    x = layer_norm(x + attn2, g2_ref[...], be2_ref[...])

    # ---- sublayer 3: feed-forward + residual + LayerNorm --------------------
    h1 = jnp.maximum(
        jnp.dot(x, w1_ref[...], preferred_element_type=jnp.float32) + b1_ref[...],
        0.0)
    ffo = jnp.dot(h1, w2_ref[...], preferred_element_type=jnp.float32) + b2_ref[...]
    x = layer_norm(x + ffo, g3_ref[...], be3_ref[...])

    o_ref[0] = x.astype(o_ref.dtype)


def prepare_params(params):
    """One-time parameter prep: fuse per-head QKV weights, fold attention scale."""
    (wq1, bq1, wk1, bk1, wv1, bv1, wo1, bo1, g1, be1,
     wq2, bq2, wk2, bk2, wv2, bv2, wo2, bo2, g2, be2,
     w1, b1, w2, b2, g3, be3) = params
    inv_scale = 1.0 / math.sqrt(DH)
    row = lambda v: v.reshape(1, -1)

    wqkv1 = jnp.concatenate([wq1 * inv_scale, wk1, wv1], axis=-1)          # (H, D, 3*DH)
    bqkv1 = jnp.concatenate([bq1 * inv_scale, bk1, bv1], axis=-1)[:, None, :]
    wkv2 = jnp.concatenate([wk2, wv2], axis=-1)                            # (H, D, 2*DH)
    bkv2 = jnp.concatenate([bk2, bv2], axis=-1)[:, None, :]

    return (wqkv1, bqkv1, wo1.reshape(H, DH, D), row(bo1), row(g1), row(be1),
            wq2 * inv_scale, (bq2 * inv_scale)[:, None, :], wkv2, bkv2,
            wo2.reshape(H, DH, D), row(bo2), row(g2), row(be2),
            w1, row(b1), w2, row(b2), row(g3), row(be3))


@jax.jit
def decoder_layer(tgt, memory, mask, prepped):
    seq_spec = pl.BlockSpec((1, S, D), lambda b: (b, 0, 0))
    mask_spec = pl.BlockSpec((1, S, S), lambda b: (b, 0, 0))

    def const_spec(x):
        n = x.ndim
        return pl.BlockSpec(x.shape, lambda b: (0,) * n)

    return pl.pallas_call(
        decoder_layer_kernel,
        out_shape=jax.ShapeDtypeStruct((B, S, D), jnp.float32),
        grid_spec=pltpu.PrefetchScalarGridSpec(
            num_scalar_prefetch=0,
            grid=(B,),
            in_specs=[seq_spec, seq_spec, mask_spec]
                     + [const_spec(p) for p in prepped],
            out_specs=seq_spec,
        ),
        compiler_params=pltpu.CompilerParams(
            dimension_semantics=("parallel",)),
    )(tgt, memory, mask, *prepped)


def reference(tgt, memory, mask, params):
    """Plain-JAX mirror of the PyTorch TransformerDecoderLayer forward (eval mode)."""
    (wq1, bq1, wk1, bk1, wv1, bv1, wo1, bo1, g1, be1,
     wq2, bq2, wk2, bk2, wv2, bv2, wo2, bo2, g2, be2,
     w1, b1, w2, b2, g3, be3) = params

    def layer_norm(v, g, b):
        mu = v.mean(-1, keepdims=True)
        var = ((v - mu) ** 2).mean(-1, keepdims=True)
        return (v - mu) / jnp.sqrt(var + LN_EPS) * g + b

    def mha(q, k, v, add_mask, wq, bq, wk, bk, wv, bv, wo, bo):
        heads = []
        for h in range(H):
            Q = q @ wq[h] + bq[h]
            K = k @ wk[h] + bk[h]
            V = v @ wv[h] + bv[h]
            s = jnp.einsum("bqd,bkd->bqk", Q, K) / math.sqrt(DH)
            if add_mask is not None:
                s = s + add_mask
            p = jax.nn.softmax(s, axis=-1)
            heads.append(jnp.einsum("bqk,bkd->bqd", p, V))
        return jnp.concatenate(heads, axis=-1) @ wo + bo

    x = layer_norm(tgt + mha(tgt, tgt, tgt, mask,
                             wq1, bq1, wk1, bk1, wv1, bv1, wo1, bo1), g1, be1)
    x = layer_norm(x + mha(x, memory, memory, None,
                           wq2, bq2, wk2, bk2, wv2, bv2, wo2, bo2), g2, be2)
    ffo = jnp.maximum(x @ w1 + b1, 0.0) @ w2 + b2
    return layer_norm(x + ffo, g3, be3)


if __name__ == "__main__":
    key = jax.random.PRNGKey(0)
    ks = jax.random.split(key, 30)
    it = iter(ks)
    nk = lambda: next(it)

    tgt = jax.random.normal(nk(), (B, S, D), jnp.float32)
    memory = jax.random.normal(nk(), (B, S, D), jnp.float32)
    # Additive causal mask, as in the PyTorch AttentionHead (score = score + mask).
    causal = jnp.where(jnp.tril(jnp.ones((S, S), bool)), 0.0, -1e9).astype(jnp.float32)
    mask = jnp.broadcast_to(causal, (B, S, S))

    ws = 1.0 / math.sqrt(D)

    def attn_params():
        wq = jax.random.normal(nk(), (H, D, DH), jnp.float32) * ws
        bq = jax.random.normal(nk(), (H, DH), jnp.float32) * 0.1
        wk = jax.random.normal(nk(), (H, D, DH), jnp.float32) * ws
        bk = jax.random.normal(nk(), (H, DH), jnp.float32) * 0.1
        wv = jax.random.normal(nk(), (H, D, DH), jnp.float32) * ws
        bv = jax.random.normal(nk(), (H, DH), jnp.float32) * 0.1
        wo = jax.random.normal(nk(), (D, D), jnp.float32) * ws
        bo = jax.random.normal(nk(), (D,), jnp.float32) * 0.1
        g = 1.0 + 0.1 * jax.random.normal(nk(), (D,), jnp.float32)
        be = 0.1 * jax.random.normal(nk(), (D,), jnp.float32)
        return wq, bq, wk, bk, wv, bv, wo, bo, g, be

    p1 = attn_params()
    p2 = attn_params()
    w1 = jax.random.normal(nk(), (D, FF), jnp.float32) * ws
    b1 = jax.random.normal(nk(), (FF,), jnp.float32) * 0.1
    w2 = jax.random.normal(nk(), (FF, D), jnp.float32) * (1.0 / math.sqrt(FF))
    b2 = jax.random.normal(nk(), (D,), jnp.float32) * 0.1
    g3 = 1.0 + 0.1 * jax.random.normal(nk(), (D,), jnp.float32)
    be3 = 0.1 * jax.random.normal(nk(), (D,), jnp.float32)

    params = (*p1, *p2, w1, b1, w2, b2, g3, be3)
    prepped = prepare_params(params)

    out = decoder_layer(tgt, memory, mask, prepped)
    out = jax.block_until_ready(out)

    ref = reference(tgt, memory, mask, params)
    assert out.shape == (B, S, D)
    err = float(jnp.max(jnp.abs(out - ref)))
    # Tolerance leaves headroom for the approx (EUP) softmax reciprocal.
    assert jnp.allclose(out, ref, atol=5e-3, rtol=5e-3), \
        f"mismatch vs reference (max abs err {err})"

    print("KERNEL_OK")
</pallas_src>

<mosaic_0001>
module attributes {stable_mosaic.version = 11 : i64} {
  func.func @decoder_layer_kernel(%arg0: i32, %arg1: memref<1x8x32xf32, #tpu.memory_space<vmem>>, %arg2: memref<1x8x32xf32, #tpu.memory_space<vmem>>, %arg3: memref<1x8x8xf32, #tpu.memory_space<vmem>>, %arg4: memref<4x32x24xf32, #tpu.memory_space<vmem>>, %arg5: memref<4x1x24xf32, #tpu.memory_space<vmem>>, %arg6: memref<4x8x32xf32, #tpu.memory_space<vmem>>, %arg7: memref<1x32xf32, #tpu.memory_space<vmem>>, %arg8: memref<1x32xf32, #tpu.memory_space<vmem>>, %arg9: memref<1x32xf32, #tpu.memory_space<vmem>>, %arg10: memref<4x32x8xf32, #tpu.memory_space<vmem>>, %arg11: memref<4x1x8xf32, #tpu.memory_space<vmem>>, %arg12: memref<4x32x16xf32, #tpu.memory_space<vmem>>, %arg13: memref<4x1x16xf32, #tpu.memory_space<vmem>>, %arg14: memref<4x8x32xf32, #tpu.memory_space<vmem>>, %arg15: memref<1x32xf32, #tpu.memory_space<vmem>>, %arg16: memref<1x32xf32, #tpu.memory_space<vmem>>, %arg17: memref<1x32xf32, #tpu.memory_space<vmem>>, %arg18: memref<32x64xf32, #tpu.memory_space<vmem>>, %arg19: memref<1x64xf32, #tpu.memory_space<vmem>>, %arg20: memref<64x32xf32, #tpu.memory_space<vmem>>, %arg21: memref<1x32xf32, #tpu.memory_space<vmem>>, %arg22: memref<1x32xf32, #tpu.memory_space<vmem>>, %arg23: memref<1x32xf32, #tpu.memory_space<vmem>>, %arg24: memref<1x8x32xf32, #tpu.memory_space<vmem>>) attributes {dimension_semantics = [#tpu.dimension_semantics<parallel>], iteration_bounds = array<i64: 2>, scalar_prefetch = 0 : i64, scratch_operands = 0 : i64, tpu.core_type = #tpu.core_type<tc>, window_params = [{transform_indices = @transform_0, window_bounds = array<i64: 1, 8, 32>}, {transform_indices = @transform_1, window_bounds = array<i64: 1, 8, 32>}, {transform_indices = @transform_2, window_bounds = array<i64: 1, 8, 8>}, {pipeline_mode = #tpu.pipeline_mode<synchronous>, transform_indices = @transform_3, window_bounds = array<i64: 4, 32, 24>}, {pipeline_mode = #tpu.pipeline_mode<synchronous>, transform_indices = @transform_4, window_bounds = array<i64: 4, 1, 24>}, {pipeline_mode = #tpu.pipeline_mode<synchronous>, transform_indices = @transform_5, window_bounds = array<i64: 4, 8, 32>}, {pipeline_mode = #tpu.pipeline_mode<synchronous>, transform_indices = @transform_6, window_bounds = array<i64: 1, 32>}, {pipeline_mode = #tpu.pipeline_mode<synchronous>, transform_indices = @transform_7, window_bounds = array<i64: 1, 32>}, {pipeline_mode = #tpu.pipeline_mode<synchronous>, transform_indices = @transform_8, window_bounds = array<i64: 1, 32>}, {pipeline_mode = #tpu.pipeline_mode<synchronous>, transform_indices = @transform_9, window_bounds = array<i64: 4, 32, 8>}, {pipeline_mode = #tpu.pipeline_mode<synchronous>, transform_indices = @transform_10, window_bounds = array<i64: 4, 1, 8>}, {pipeline_mode = #tpu.pipeline_mode<synchronous>, transform_indices = @transform_11, window_bounds = array<i64: 4, 32, 16>}, {pipeline_mode = #tpu.pipeline_mode<synchronous>, transform_indices = @transform_12, window_bounds = array<i64: 4, 1, 16>}, {pipeline_mode = #tpu.pipeline_mode<synchronous>, transform_indices = @transform_13, window_bounds = array<i64: 4, 8, 32>}, {pipeline_mode = #tpu.pipeline_mode<synchronous>, transform_indices = @transform_14, window_bounds = array<i64: 1, 32>}, {pipeline_mode = #tpu.pipeline_mode<synchronous>, transform_indices = @transform_15, window_bounds = array<i64: 1, 32>}, {pipeline_mode = #tpu.pipeline_mode<synchronous>, transform_indices = @transform_16, window_bounds = array<i64: 1, 32>}, {pipeline_mode = #tpu.pipeline_mode<synchronous>, transform_indices = @transform_17, window_bounds = array<i64: 32, 64>}, {pipeline_mode = #tpu.pipeline_mode<synchronous>, transform_indices = @transform_18, window_bounds = array<i64: 1, 64>}, {pipeline_mode = #tpu.pipeline_mode<synchronous>, transform_indices = @transform_19, window_bounds = array<i64: 64, 32>}, {pipeline_mode = #tpu.pipeline_mode<synchronous>, transform_indices = @transform_20, window_bounds = array<i64: 1, 32>}, {pipeline_mode = #tpu.pipeline_mode<synchronous>, transform_indices = @transform_21, window_bounds = array<i64: 1, 32>}, {pipeline_mode = #tpu.pipeline_mode<synchronous>, transform_indices = @transform_22, window_bounds = array<i64: 1, 32>}, {transform_indices = @transform_23, window_bounds = array<i64: 1, 8, 32>}]} {
    %c0 = arith.constant 0 : index
    %c0_0 = arith.constant 0 : index
    %c0_1 = arith.constant 0 : index
    %0 = vector.load %arg1[%c0, %c0_0, %c0_1] : memref<1x8x32xf32, #tpu.memory_space<vmem>>, vector<1x8x32xf32>
    %1 = vector.shape_cast %0 : vector<1x8x32xf32> to vector<8x32xf32>
    %c0_2 = arith.constant 0 : index
    %c0_3 = arith.constant 0 : index
    %c0_4 = arith.constant 0 : index
    %2 = vector.load %arg2[%c0_2, %c0_3, %c0_4] : memref<1x8x32xf32, #tpu.memory_space<vmem>>, vector<1x8x32xf32>
    %3 = vector.shape_cast %2 : vector<1x8x32xf32> to vector<8x32xf32>
    %c0_5 = arith.constant 0 : index
    %c0_6 = arith.constant 0 : index
    %c0_7 = arith.constant 0 : index
    %4 = vector.load %arg3[%c0_5, %c0_6, %c0_7] : memref<1x8x8xf32, #tpu.memory_space<vmem>>, vector<1x8x8xf32>
    %5 = vector.shape_cast %4 : vector<1x8x8xf32> to vector<8x8xf32>
    %6 = vector.shape_cast %1 : vector<8x32xf32> to vector<1x8x32xf32>
    %7 = vector.broadcast %6 : vector<1x8x32xf32> to vector<4x8x32xf32>
    %c0_8 = arith.constant 0 : index
    %c0_9 = arith.constant 0 : index
    %c0_10 = arith.constant 0 : index
    %8 = vector.load %arg4[%c0_8, %c0_9, %c0_10] : memref<4x32x24xf32, #tpu.memory_space<vmem>>, vector<4x32x24xf32>
    "tpu.trace_start"() <{level = 10 : i32, message = "hsd,hde->hse"}> : () -> ()
    %cst = arith.constant dense<0.000000e+00> : vector<4x8x24xf32>
    %9 = tpu.matmul %7, %8, %cst {dimension_numbers = #tpu.dot_dimension_numbers<[2], [1], [1], [2], [0, 0, 0, 1, 1, 2], [0], [0]>} : vector<4x8x32xf32>, vector<4x32x24xf32>, vector<4x8x24xf32> -> vector<4x8x24xf32>
    "tpu.trace_stop"() : () -> ()
    %c0_11 = arith.constant 0 : index
    %c0_12 = arith.constant 0 : index
    %c0_13 = arith.constant 0 : index
    %10 = vector.load %arg5[%c0_11, %c0_12, %c0_13] : memref<4x1x24xf32, #tpu.memory_space<vmem>>, vector<4x1x24xf32>
    %11 = vector.broadcast %10 : vector<4x1x24xf32> to vector<4x8x24xf32>
    %12 = arith.addf %9, %11 : vector<4x8x24xf32>
    %13 = vector.extract_strided_slice %12 {offsets = [0, 0, 0], sizes = [4, 8, 8], strides = [1, 1, 1]} : vector<4x8x24xf32> to vector<4x8x8xf32>
    %14 = vector.extract_strided_slice %12 {offsets = [0, 0, 8], sizes = [4, 8, 8], strides = [1, 1, 1]} : vector<4x8x24xf32> to vector<4x8x8xf32>
    %15 = vector.extract_strided_slice %12 {offsets = [0, 0, 16], sizes = [4, 8, 8], strides = [1, 1, 1]} : vector<4x8x24xf32> to vector<4x8x8xf32>
    %c0_14 = arith.constant 0 : index
    %c0_15 = arith.constant 0 : index
    %c0_16 = arith.constant 0 : index
    %16 = vector.load %arg6[%c0_14, %c0_15, %c0_16] : memref<4x8x32xf32, #tpu.memory_space<vmem>>, vector<4x8x32xf32>
    %c0_17 = arith.constant 0 : index
    %c0_18 = arith.constant 0 : index
    %17 = vector.load %arg7[%c0_17, %c0_18] : memref<1x32xf32, #tpu.memory_space<vmem>>, vector<1x32xf32>
    "tpu.trace_start"() <{level = 10 : i32, message = "hqd,hkd->hqk"}> : () -> ()
    %cst_19 = arith.constant dense<0.000000e+00> : vector<4x8x8xf32>
    %18 = tpu.matmul %13, %14, %cst_19 {dimension_numbers = #tpu.dot_dimension_numbers<[2], [2], [1], [1], [0, 0, 0, 1, 1, 1], [0], [0]>} : vector<4x8x8xf32>, vector<4x8x8xf32>, vector<4x8x8xf32> -> vector<4x8x8xf32>
    "tpu.trace_stop"() : () -> ()
    %19 = vector.shape_cast %5 : vector<8x8xf32> to vector<1x8x8xf32>
    %20 = vector.broadcast %19 : vector<1x8x8xf32> to vector<4x8x8xf32>
    %21 = arith.addf %18, %20 : vector<4x8x8xf32>
    %cst_20 = arith.constant dense<0xFF800000> : vector<4x8xf32>
    %22 = vector.multi_reduction <maximumf>, %21, %cst_20 [2] : vector<4x8x8xf32> to vector<4x8xf32>
    %23 = vector.shape_cast %22 : vector<4x8xf32> to vector<4x8x1xf32>
    %24 = vector.broadcast %23 : vector<4x8x1xf32> to vector<4x8x8xf32>
    %25 = arith.subf %21, %24 : vector<4x8x8xf32>
    %26 = math.exp %25 : vector<4x8x8xf32>
    %cst_21 = arith.constant dense<0.000000e+00> : vector<4x8xf32>
    %27 = vector.multi_reduction <add>, %26, %cst_21 [2] : vector<4x8x8xf32> to vector<4x8xf32>
    %28 = vector.shape_cast %27 : vector<4x8xf32> to vector<4x8x1xf32>
    %29 = tpu.reciprocal %28 {approx = true} : vector<4x8x1xf32> -> vector<4x8x1xf32>
    %30 = vector.broadcast %29 : vector<4x8x1xf32> to vector<4x8x8xf32>
    %31 = arith.mulf %26, %30 : vector<4x8x8xf32>
    "tpu.trace_start"() <{level = 10 : i32, message = "hqk,hkd->hqd"}> : () -> ()
    %cst_22 = arith.constant dense<0.000000e+00> : vector<4x8x8xf32>
    %32 = tpu.matmul %31, %15, %cst_22 {dimension_numbers = #tpu.dot_dimension_numbers<[2], [1], [1], [2], [0, 0, 0, 1, 1, 2], [0], [0]>} : vector<4x8x8xf32>, vector<4x8x8xf32>, vector<4x8x8xf32> -> vector<4x8x8xf32>
    "tpu.trace_stop"() : () -> ()
    "tpu.trace_start"() <{level = 10 : i32, message = "hqd,hdf->hqf"}> : () -> ()
    %cst_23 = arith.constant dense<0.000000e+00> : vector<4x8x32xf32>
    %33 = tpu.matmul %32, %16, %cst_23 {dimension_numbers = #tpu.dot_dimension_numbers<[2], [1], [1], [2], [0, 0, 0, 1, 1, 2], [0], [0]>} : vector<4x8x8xf32>, vector<4x8x32xf32>, vector<4x8x32xf32> -> vector<4x8x32xf32>
    "tpu.trace_stop"() : () -> ()
    %cst_24 = arith.constant dense<0.000000e+00> : vector<8x32xf32>
    %34 = vector.multi_reduction <add>, %33, %cst_24 [0] : vector<4x8x32xf32> to vector<8x32xf32>
    %35 = vector.broadcast %17 : vector<1x32xf32> to vector<8x32xf32>
    %36 = arith.addf %34, %35 : vector<8x32xf32>
    %37 = arith.addf %1, %36 : vector<8x32xf32>
    %c0_25 = arith.constant 0 : index
    %c0_26 = arith.constant 0 : index
    %38 = vector.load %arg8[%c0_25, %c0_26] : memref<1x32xf32, #tpu.memory_space<vmem>>, vector<1x32xf32>
    %c0_27 = arith.constant 0 : index
    %c0_28 = arith.constant 0 : index
    %39 = vector.load %arg9[%c0_27, %c0_28] : memref<1x32xf32, #tpu.memory_space<vmem>>, vector<1x32xf32>
    %cst_29 = arith.constant dense<0.000000e+00> : vector<8xf32>
    %40 = vector.multi_reduction <add>, %37, %cst_29 [1] : vector<8x32xf32> to vector<8xf32>
    %41 = vector.shape_cast %40 : vector<8xf32> to vector<8x1xf32>
    %cst_30 = arith.constant 3.200000e+01 : f32
    %42 = vector.broadcast %cst_30 : f32 to vector<8x1xf32>
    %43 = arith.divf %41, %42 : vector<8x1xf32>
    %44 = vector.broadcast %43 : vector<8x1xf32> to vector<8x32xf32>
    %45 = arith.subf %37, %44 : vector<8x32xf32>
    %46 = arith.mulf %45, %45 : vector<8x32xf32>
    %cst_31 = arith.constant dense<0.000000e+00> : vector<8xf32>
    %47 = vector.multi_reduction <add>, %46, %cst_31 [1] : vector<8x32xf32> to vector<8xf32>
    %48 = vector.shape_cast %47 : vector<8xf32> to vector<8x1xf32>
    %cst_32 = arith.constant 3.200000e+01 : f32
    %49 = vector.broadcast %cst_32 : f32 to vector<8x1xf32>
    %50 = arith.divf %48, %49 : vector<8x1xf32>
    %cst_33 = arith.constant 9.99999974E-6 : f32
    %51 = vector.broadcast %cst_33 : f32 to vector<8x1xf32>
    %52 = arith.addf %50, %51 : vector<8x1xf32>
    %53 = math.rsqrt %52 : vector<8x1xf32>
    %54 = vector.broadcast %53 : vector<8x1xf32> to vector<8x32xf32>
    %55 = arith.mulf %45, %54 : vector<8x32xf32>
    %56 = vector.broadcast %38 : vector<1x32xf32> to vector<8x32xf32>
    %57 = arith.mulf %55, %56 : vector<8x32xf32>
    %58 = vector.broadcast %39 : vector<1x32xf32> to vector<8x32xf32>
    %59 = arith.addf %57, %58 : vector<8x32xf32>
    %60 = vector.shape_cast %59 : vector<8x32xf32> to vector<1x8x32xf32>
    %61 = vector.broadcast %60 : vector<1x8x32xf32> to vector<4x8x32xf32>
    %c0_34 = arith.constant 0 : index
    %c0_35 = arith.constant 0 : index
    %c0_36 = arith.constant 0 : index
    %62 = vector.load %arg10[%c0_34, %c0_35, %c0_36] : memref<4x32x8xf32, #tpu.memory_space<vmem>>, vector<4x32x8xf32>
    "tpu.trace_start"() <{level = 10 : i32, message = "hsd,hde->hse"}> : () -> ()
    %cst_37 = arith.constant dense<0.000000e+00> : vector<4x8x8xf32>
    %63 = tpu.matmul %61, %62, %cst_37 {dimension_numbers = #tpu.dot_dimension_numbers<[2], [1], [1], [2], [0, 0, 0, 1, 1, 2], [0], [0]>} : vector<4x8x32xf32>, vector<4x32x8xf32>, vector<4x8x8xf32> -> vector<4x8x8xf32>
    "tpu.trace_stop"() : () -> ()
    %c0_38 = arith.constant 0 : index
    %c0_39 = arith.constant 0 : index
    %c0_40 = arith.constant 0 : index
    %64 = vector.load %arg11[%c0_38, %c0_39, %c0_40] : memref<4x1x8xf32, #tpu.memory_space<vmem>>, vector<4x1x8xf32>
    %65 = vector.broadcast %64 : vector<4x1x8xf32> to vector<4x8x8xf32>
    %66 = arith.addf %63, %65 : vector<4x8x8xf32>
    %67 = vector.shape_cast %3 : vector<8x32xf32> to vector<1x8x32xf32>
    %68 = vector.broadcast %67 : vector<1x8x32xf32> to vector<4x8x32xf32>
    %c0_41 = arith.constant 0 : index
    %c0_42 = arith.constant 0 : index
    %c0_43 = arith.constant 0 : index
    %69 = vector.load %arg12[%c0_41, %c0_42, %c0_43] : memref<4x32x16xf32, #tpu.memory_space<vmem>>, vector<4x32x16xf32>
    "tpu.trace_start"() <{level = 10 : i32, message = "hsd,hde->hse"}> : () -> ()
    %cst_44 = arith.constant dense<0.000000e+00> : vector<4x8x16xf32>
    %70 = tpu.matmul %68, %69, %cst_44 {dimension_numbers = #tpu.dot_dimension_numbers<[2], [1], [1], [2], [0, 0, 0, 1, 1, 2], [0], [0]>} : vector<4x8x32xf32>, vector<4x32x16xf32>, vector<4x8x16xf32> -> vector<4x8x16xf32>
    "tpu.trace_stop"() : () -> ()
    %c0_45 = arith.constant 0 : index
    %c0_46 = arith.constant 0 : index
    %c0_47 = arith.constant 0 : index
    %71 = vector.load %arg13[%c0_45, %c0_46, %c0_47] : memref<4x1x16xf32, #tpu.memory_space<vmem>>, vector<4x1x16xf32>
    %72 = vector.broadcast %71 : vector<4x1x16xf32> to vector<4x8x16xf32>
    %73 = arith.addf %70, %72 : vector<4x8x16xf32>
    %74 = vector.extract_strided_slice %73 {offsets = [0, 0, 0], sizes = [4, 8, 8], strides = [1, 1, 1]} : vector<4x8x16xf32> to vector<4x8x8xf32>
    %75 = vector.extract_strided_slice %73 {offsets = [0, 0, 8], sizes = [4, 8, 8], strides = [1, 1, 1]} : vector<4x8x16xf32> to vector<4x8x8xf32>
    %c0_48 = arith.constant 0 : index
    %c0_49 = arith.constant 0 : index
    %c0_50 = arith.constant 0 : index
    %76 = vector.load %arg14[%c0_48, %c0_49, %c0_50] : memref<4x8x32xf32, #tpu.memory_space<vmem>>, vector<4x8x32xf32>
    %c0_51 = arith.constant 0 : index
    %c0_52 = arith.constant 0 : index
    %77 = vector.load %arg15[%c0_51, %c0_52] : memref<1x32xf32, #tpu.memory_space<vmem>>, vector<1x32xf32>
    "tpu.trace_start"() <{level = 10 : i32, message = "hqd,hkd->hqk"}> : () -> ()
    %cst_53 = arith.constant dense<0.000000e+00> : vector<4x8x8xf32>
    %78 = tpu.matmul %66, %74, %cst_53 {dimension_numbers = #tpu.dot_dimension_numbers<[2], [2], [1], [1], [0, 0, 0, 1, 1, 1], [0], [0]>} : vector<4x8x8xf32>, vector<4x8x8xf32>, vector<4x8x8xf32> -> vector<4x8x8xf32>
    "tpu.trace_stop"() : () -> ()
    %cst_54 = arith.constant dense<0xFF800000> : vector<4x8xf32>
    %79 = vector.multi_reduction <maximumf>, %78, %cst_54 [2] : vector<4x8x8xf32> to vector<4x8xf32>
    %80 = vector.shape_cast %79 : vector<4x8xf32> to vector<4x8x1xf32>
    %81 = vector.broadcast %80 : vector<4x8x1xf32> to vector<4x8x8xf32>
    %82 = arith.subf %78, %81 : vector<4x8x8xf32>
    %83 = math.exp %82 : vector<4x8x8xf32>
    %cst_55 = arith.constant dense<0.000000e+00> : vector<4x8xf32>
    %84 = vector.multi_reduction <add>, %83, %cst_55 [2] : vector<4x8x8xf32> to vector<4x8xf32>
    %85 = vector.shape_cast %84 : vector<4x8xf32> to vector<4x8x1xf32>
    %86 = tpu.reciprocal %85 {approx = true} : vector<4x8x1xf32> -> vector<4x8x1xf32>
    %87 = vector.broadcast %86 : vector<4x8x1xf32> to vector<4x8x8xf32>
    %88 = arith.mulf %83, %87 : vector<4x8x8xf32>
    "tpu.trace_start"() <{level = 10 : i32, message = "hqk,hkd->hqd"}> : () -> ()
    %cst_56 = arith.constant dense<0.000000e+00> : vector<4x8x8xf32>
    %89 = tpu.matmul %88, %75, %cst_56 {dimension_numbers = #tpu.dot_dimension_numbers<[2], [1], [1], [2], [0, 0, 0, 1, 1, 2], [0], [0]>} : vector<4x8x8xf32>, vector<4x8x8xf32>, vector<4x8x8xf32> -> vector<4x8x8xf32>
    "tpu.trace_stop"() : () -> ()
    "tpu.trace_start"() <{level = 10 : i32, message = "hqd,hdf->hqf"}> : () -> ()
    %cst_57 = arith.constant dense<0.000000e+00> : vector<4x8x32xf32>
    %90 = tpu.matmul %89, %76, %cst_57 {dimension_numbers = #tpu.dot_dimension_numbers<[2], [1], [1], [2], [0, 0, 0, 1, 1, 2], [0], [0]>} : vector<4x8x8xf32>, vector<4x8x32xf32>, vector<4x8x32xf32> -> vector<4x8x32xf32>
    "tpu.trace_stop"() : () -> ()
    %cst_58 = arith.constant dense<0.000000e+00> : vector<8x32xf32>
    %91 = vector.multi_reduction <add>, %90, %cst_58 [0] : vector<4x8x32xf32> to vector<8x32xf32>
    %92 = vector.broadcast %77 : vector<1x32xf32> to vector<8x32xf32>
    %93 = arith.addf %91, %92 : vector<8x32xf32>
    %94 = arith.addf %59, %93 : vector<8x32xf32>
    %c0_59 = arith.constant 0 : index
    %c0_60 = arith.constant 0 : index
    %95 = vector.load %arg16[%c0_59, %c0_60] : memref<1x32xf32, #tpu.memory_space<vmem>>, vector<1x32xf32>
    %c0_61 = arith.constant 0 : index
    %c0_62 = arith.constant 0 : index
    %96 = vector.load %arg17[%c0_61, %c0_62] : memref<1x32xf32, #tpu.memory_space<vmem>>, vector<1x32xf32>
    %cst_63 = arith.constant dense<0.000000e+00> : vector<8xf32>
    %97 = vector.multi_reduction <add>, %94, %cst_63 [1] : vector<8x32xf32> to vector<8xf32>
    %98 = vector.shape_cast %97 : vector<8xf32> to vector<8x1xf32>
    %cst_64 = arith.constant 3.200000e+01 : f32
    %99 = vector.broadcast %cst_64 : f32 to vector<8x1xf32>
    %100 = arith.divf %98, %99 : vector<8x1xf32>
    %101 = vector.broadcast %100 : vector<8x1xf32> to vector<8x32xf32>
    %102 = arith.subf %94, %101 : vector<8x32xf32>
    %103 = arith.mulf %102, %102 : vector<8x32xf32>
    %cst_65 = arith.constant dense<0.000000e+00> : vector<8xf32>
    %104 = vector.multi_reduction <add>, %103, %cst_65 [1] : vector<8x32xf32> to vector<8xf32>
    %105 = vector.shape_cast %104 : vector<8xf32> to vector<8x1xf32>
    %cst_66 = arith.constant 3.200000e+01 : f32
    %106 = vector.broadcast %cst_66 : f32 to vector<8x1xf32>
    %107 = arith.divf %105, %106 : vector<8x1xf32>
    %cst_67 = arith.constant 9.99999974E-6 : f32
    %108 = vector.broadcast %cst_67 : f32 to vector<8x1xf32>
    %109 = arith.addf %107, %108 : vector<8x1xf32>
    %110 = math.rsqrt %109 : vector<8x1xf32>
    %111 = vector.broadcast %110 : vector<8x1xf32> to vector<8x32xf32>
    %112 = arith.mulf %102, %111 : vector<8x32xf32>
    %113 = vector.broadcast %95 : vector<1x32xf32> to vector<8x32xf32>
    %114 = arith.mulf %112, %113 : vector<8x32xf32>
    %115 = vector.broadcast %96 : vector<1x32xf32> to vector<8x32xf32>
    %116 = arith.addf %114, %115 : vector<8x32xf32>
    %c0_68 = arith.constant 0 : index
    %c0_69 = arith.constant 0 : index
    %117 = vector.load %arg18[%c0_68, %c0_69] : memref<32x64xf32, #tpu.memory_space<vmem>>, vector<32x64xf32>
    %cst_70 = arith.constant dense<0.000000e+00> : vector<8x64xf32>
    %118 = tpu.matmul %116, %117, %cst_70 {dimension_numbers = #tpu.dot_dimension_numbers<[1], [0], [0], [1], [0, 0, 1, 1], [], []>} : vector<8x32xf32>, vector<32x64xf32>, vector<8x64xf32> -> vector<8x64xf32>
    %c0_71 = arith.constant 0 : index
    %c0_72 = arith.constant 0 : index
    %119 = vector.load %arg19[%c0_71, %c0_72] : memref<1x64xf32, #tpu.memory_space<vmem>>, vector<1x64xf32>
    %120 = vector.broadcast %119 : vector<1x64xf32> to vector<8x64xf32>
    %121 = arith.addf %118, %120 : vector<8x64xf32>
    %cst_73 = arith.constant 0.000000e+00 : f32
    %122 = vector.broadcast %cst_73 : f32 to vector<8x64xf32>
    %123 = arith.maximumf %121, %122 : vector<8x64xf32>
    %c0_74 = arith.constant 0 : index
    %c0_75 = arith.constant 0 : index
    %124 = vector.load %arg20[%c0_74, %c0_75] : memref<64x32xf32, #tpu.memory_space<vmem>>, vector<64x32xf32>
    %cst_76 = arith.constant dense<0.000000e+00> : vector<8x32xf32>
    %125 = tpu.matmul %123, %124, %cst_76 {dimension_numbers = #tpu.dot_dimension_numbers<[1], [0], [0], [1], [0, 0, 1, 1], [], []>} : vector<8x64xf32>, vector<64x32xf32>, vector<8x32xf32> -> vector<8x32xf32>
    %c0_77 = arith.constant 0 : index
    %c0_78 = arith.constant 0 : index
    %126 = vector.load %arg21[%c0_77, %c0_78] : memref<1x32xf32, #tpu.memory_space<vmem>>, vector<1x32xf32>
    %127 = vector.broadcast %126 : vector<1x32xf32> to vector<8x32xf32>
    %128 = arith.addf %125, %127 : vector<8x32xf32>
    %129 = arith.addf %116, %128 : vector<8x32xf32>
    %c0_79 = arith.constant 0 : index
    %c0_80 = arith.constant 0 : index
    %130 = vector.load %arg22[%c0_79, %c0_80] : memref<1x32xf32, #tpu.memory_space<vmem>>, vector<1x32xf32>
    %c0_81 = arith.constant 0 : index
    %c0_82 = arith.constant 0 : index
    %131 = vector.load %arg23[%c0_81, %c0_82] : memref<1x32xf32, #tpu.memory_space<vmem>>, vector<1x32xf32>
    %cst_83 = arith.constant dense<0.000000e+00> : vector<8xf32>
    %132 = vector.multi_reduction <add>, %129, %cst_83 [1] : vector<8x32xf32> to vector<8xf32>
    %133 = vector.shape_cast %132 : vector<8xf32> to vector<8x1xf32>
    %cst_84 = arith.constant 3.200000e+01 : f32
    %134 = vector.broadcast %cst_84 : f32 to vector<8x1xf32>
    %135 = arith.divf %133, %134 : vector<8x1xf32>
    %136 = vector.broadcast %135 : vector<8x1xf32> to vector<8x32xf32>
    %137 = arith.subf %129, %136 : vector<8x32xf32>
    %138 = arith.mulf %137, %137 : vector<8x32xf32>
    %cst_85 = arith.constant dense<0.000000e+00> : vector<8xf32>
    %139 = vector.multi_reduction <add>, %138, %cst_85 [1] : vector<8x32xf32> to vector<8xf32>
    %140 = vector.shape_cast %139 : vector<8xf32> to vector<8x1xf32>
    %cst_86 = arith.constant 3.200000e+01 : f32
    %141 = vector.broadcast %cst_86 : f32 to vector<8x1xf32>
    %142 = arith.divf %140, %141 : vector<8x1xf32>
    %cst_87 = arith.constant 9.99999974E-6 : f32
    %143 = vector.broadcast %cst_87 : f32 to vector<8x1xf32>
    %144 = arith.addf %142, %143 : vector<8x1xf32>
    %145 = math.rsqrt %144 : vector<8x1xf32>
    %146 = vector.broadcast %145 : vector<8x1xf32> to vector<8x32xf32>
    %147 = arith.mulf %137, %146 : vector<8x32xf32>
    %148 = vector.broadcast %130 : vector<1x32xf32> to vector<8x32xf32>
    %149 = arith.mulf %147, %148 : vector<8x32xf32>
    %150 = vector.broadcast %131 : vector<1x32xf32> to vector<8x32xf32>
    %151 = arith.addf %149, %150 : vector<8x32xf32>
    %c0_88 = arith.constant 0 : index
    %c0_89 = arith.constant 0 : index
    %c0_90 = arith.constant 0 : index
    %152 = vector.load %arg24[%c0_88, %c0_89, %c0_90] : memref<1x8x32xf32, #tpu.memory_space<vmem>>, vector<1x8x32xf32>
    %153 = vector.shape_cast %152 : vector<1x8x32xf32> to vector<8x32xf32>
    %154 = vector.shape_cast %151 : vector<8x32xf32> to vector<1x8x32xf32>
    tpu.vector_store %arg24[%c0_88, %c0_89, %c0_90], %154 {strides = array<i32>} : memref<1x8x32xf32, #tpu.memory_space<vmem>>, vector<1x8x32xf32>,
    return
  }
  func.func @transform_0(%arg0: i32) -> (i32, i32, i32) {
    %c0_i32 = arith.constant 0 : i32
    %c0_i32_0 = arith.constant 0 : i32
    %c0_i32_1 = arith.constant 0 : i32
    return %arg0, %c0_i32, %c0_i32_0 : i32, i32, i32
  }
  func.func @transform_1(%arg0: i32) -> (i32, i32, i32) {
    %c0_i32 = arith.constant 0 : i32
    %c0_i32_0 = arith.constant 0 : i32
    %c0_i32_1 = arith.constant 0 : i32
    return %arg0, %c0_i32, %c0_i32_0 : i32, i32, i32
  }
  func.func @transform_2(%arg0: i32) -> (i32, i32, i32) {
    %c0_i32 = arith.constant 0 : i32
    %c0_i32_0 = arith.constant 0 : i32
    %c0_i32_1 = arith.constant 0 : i32
    return %arg0, %c0_i32, %c0_i32_0 : i32, i32, i32
  }
  func.func @transform_3(%arg0: i32) -> (i32, i32, i32) {
    %c0_i32 = arith.constant 0 : i32
    %c0_i32_0 = arith.constant 0 : i32
    %c0_i32_1 = arith.constant 0 : i32
    %c0_i32_2 = arith.constant 0 : i32
    return %c0_i32, %c0_i32_0, %c0_i32_1 : i32, i32, i32
  }
  func.func @transform_4(%arg0: i32) -> (i32, i32, i32) {
    %c0_i32 = arith.constant 0 : i32
    %c0_i32_0 = arith.constant 0 : i32
    %c0_i32_1 = arith.constant 0 : i32
    %c0_i32_2 = arith.constant 0 : i32
    return %c0_i32, %c0_i32_0, %c0_i32_1 : i32, i32, i32
  }
  func.func @transform_5(%arg0: i32) -> (i32, i32, i32) {
    %c0_i32 = arith.constant 0 : i32
    %c0_i32_0 = arith.constant 0 : i32
    %c0_i32_1 = arith.constant 0 : i32
    %c0_i32_2 = arith.constant 0 : i32
    return %c0_i32, %c0_i32_0, %c0_i32_1 : i32, i32, i32
  }
  func.func @transform_6(%arg0: i32) -> (i32, i32) {
    %c0_i32 = arith.constant 0 : i32
    %c0_i32_0 = arith.constant 0 : i32
    %c0_i32_1 = arith.constant 0 : i32
    return %c0_i32, %c0_i32_0 : i32, i32
  }
  func.func @transform_7(%arg0: i32) -> (i32, i32) {
    %c0_i32 = arith.constant 0 : i32
    %c0_i32_0 = arith.constant 0 : i32
    %c0_i32_1 = arith.constant 0 : i32
    return %c0_i32, %c0_i32_0 : i32, i32
  }
  func.func @transform_8(%arg0: i32) -> (i32, i32) {
    %c0_i32 = arith.constant 0 : i32
    %c0_i32_0 = arith.constant 0 : i32
    %c0_i32_1 = arith.constant 0 : i32
    return %c0_i32, %c0_i32_0 : i32, i32
  }
  func.func @transform_9(%arg0: i32) -> (i32, i32, i32) {
    %c0_i32 = arith.constant 0 : i32
    %c0_i32_0 = arith.constant 0 : i32
    %c0_i32_1 = arith.constant 0 : i32
    %c0_i32_2 = arith.constant 0 : i32
    return %c0_i32, %c0_i32_0, %c0_i32_1 : i32, i32, i32
  }
  func.func @transform_10(%arg0: i32) -> (i32, i32, i32) {
    %c0_i32 = arith.constant 0 : i32
    %c0_i32_0 = arith.constant 0 : i32
    %c0_i32_1 = arith.constant 0 : i32
    %c0_i32_2 = arith.constant 0 : i32
    return %c0_i32, %c0_i32_0, %c0_i32_1 : i32, i32, i32
  }
  func.func @transform_11(%arg0: i32) -> (i32, i32, i32) {
    %c0_i32 = arith.constant 0 : i32
    %c0_i32_0 = arith.constant 0 : i32
    %c0_i32_1 = arith.constant 0 : i32
    %c0_i32_2 = arith.constant 0 : i32
    return %c0_i32, %c0_i32_0, %c0_i32_1 : i32, i32, i32
  }
  func.func @transform_12(%arg0: i32) -> (i32, i32, i32) {
    %c0_i32 = arith.constant 0 : i32
    %c0_i32_0 = arith.constant 0 : i32
    %c0_i32_1 = arith.constant 0 : i32
    %c0_i32_2 = arith.constant 0 : i32
    return %c0_i32, %c0_i32_0, %c0_i32_1 : i32, i32, i32
  }
  func.func @transform_13(%arg0: i32) -> (i32, i32, i32) {
    %c0_i32 = arith.constant 0 : i32
    %c0_i32_0 = arith.constant 0 : i32
    %c0_i32_1 = arith.constant 0 : i32
    %c0_i32_2 = arith.constant 0 : i32
    return %c0_i32, %c0_i32_0, %c0_i32_1 : i32, i32, i32
  }
  func.func @transform_14(%arg0: i32) -> (i32, i32) {
    %c0_i32 = arith.constant 0 : i32
    %c0_i32_0 = arith.constant 0 : i32
    %c0_i32_1 = arith.constant 0 : i32
    return %c0_i32, %c0_i32_0 : i32, i32
  }
  func.func @transform_15(%arg0: i32) -> (i32, i32) {
    %c0_i32 = arith.constant 0 : i32
    %c0_i32_0 = arith.constant 0 : i32
    %c0_i32_1 = arith.constant 0 : i32
    return %c0_i32, %c0_i32_0 : i32, i32
  }
  func.func @transform_16(%arg0: i32) -> (i32, i32) {
    %c0_i32 = arith.constant 0 : i32
    %c0_i32_0 = arith.constant 0 : i32
    %c0_i32_1 = arith.constant 0 : i32
    return %c0_i32, %c0_i32_0 : i32, i32
  }
  func.func @transform_17(%arg0: i32) -> (i32, i32) {
    %c0_i32 = arith.constant 0 : i32
    %c0_i32_0 = arith.constant 0 : i32
    %c0_i32_1 = arith.constant 0 : i32
    return %c0_i32, %c0_i32_0 : i32, i32
  }
  func.func @transform_18(%arg0: i32) -> (i32, i32) {
    %c0_i32 = arith.constant 0 : i32
    %c0_i32_0 = arith.constant 0 : i32
    %c0_i32_1 = arith.constant 0 : i32
    return %c0_i32, %c0_i32_0 : i32, i32
  }
  func.func @transform_19(%arg0: i32) -> (i32, i32) {
    %c0_i32 = arith.constant 0 : i32
    %c0_i32_0 = arith.constant 0 : i32
    %c0_i32_1 = arith.constant 0 : i32
    return %c0_i32, %c0_i32_0 : i32, i32
  }
  func.func @transform_20(%arg0: i32) -> (i32, i32) {
    %c0_i32 = arith.constant 0 : i32
    %c0_i32_0 = arith.constant 0 : i32
    %c0_i32_1 = arith.constant 0 : i32
    return %c0_i32, %c0_i32_0 : i32, i32
  }
  func.func @transform_21(%arg0: i32) -> (i32, i32) {
    %c0_i32 = arith.constant 0 : i32
    %c0_i32_0 = arith.constant 0 : i32
    %c0_i32_1 = arith.constant 0 : i32
    return %c0_i32, %c0_i32_0 : i32, i32
  }
  func.func @transform_22(%arg0: i32) -> (i32, i32) {
    %c0_i32 = arith.constant 0 : i32
    %c0_i32_0 = arith.constant 0 : i32
    %c0_i32_1 = arith.constant 0 : i32
    return %c0_i32, %c0_i32_0 : i32, i32
  }
  func.func @transform_23(%arg0: i32) -> (i32, i32, i32) {
    %c0_i32 = arith.constant 0 : i32
    %c0_i32_0 = arith.constant 0 : i32
    %c0_i32_1 = arith.constant 0 : i32
    return %arg0, %c0_i32, %c0_i32_0 : i32, i32, i32
  }
}

</mosaic_0001>

<bundles_post_ra>
// kernel: decoder_layer.1
= control target key start
LH: loop header
LB: loop body
LE: loop exit
PB: predicated region body
PF: predicated region fallthrough
CT: control target
= control target key end

     0   :  { %s2944_s0 = inlined_call_operand.vmem [shape: f32[2,8,32], index: 0, kind: input, shape index: {}]   ;;  %s2945_s1 = inlined_call_operand.vmem [shape: f32[2,8,32], index: 1, kind: input, shape index: {}]   ;;  %s2946_s2 = inlined_call_operand.vmem [shape: f32[2,8,8], index: 2, kind: input, shape index: {}]   ;;  %s2947_s3 = inlined_call_operand.vmem [shape: f32[4,32,24], index: 3, kind: input, shape index: {}]   ;;  %s2948_s4 = inlined_call_operand.vmem [shape: f32[4,1,24], index: 4, kind: input, shape index: {}]   ;;  %s2949_s5 = inlined_call_operand.vmem [shape: f32[4,8,32], index: 5, kind: input, shape index: {}]   ;;  %s2950_s6 = inlined_call_operand.vmem [shape: f32[1,32], index: 6, kind: input, shape index: {}]   ;;  %s2951_s7 = inlined_call_operand.vmem [shape: f32[1,32], index: 7, kind: input, shape index: {}]   ;;  %s2952_s8 = inlined_call_operand.vmem [shape: f32[1,32], index: 8, kind: input, shape index: {}]   ;;  %s2953_s9 = inlined_call_operand.vmem [shape: f32[4,32,8], index: 9, kind: input, shape index: {}]   ;;  %s2954_s10 = inlined_call_operand.vmem [shape: f32[4,1,8], index: 10, kind: input, shape index: {}]   ;;  %s2955_s11 = inlined_call_operand.vmem [shape: f32[4,32,16], index: 11, kind: input, shape index: {}]   ;;  %s2956_s12 = inlined_call_operand.vmem [shape: f32[4,1,16], index: 12, kind: input, shape index: {}]   ;;  %s2957_s13 = inlined_call_operand.vmem [shape: f32[4,8,32], index: 13, kind: input, shape index: {}]   ;;  %s2958_s14 = inlined_call_operand.vmem [shape: f32[1,32], index: 14, kind: input, shape index: {}]   ;;  %s2959_s15 = inlined_call_operand.vmem [shape: f32[1,32], index: 15, kind: input, shape index: {}]   ;;  %s2960_s16 = inlined_call_operand.vmem [shape: f32[1,32], index: 16, kind: input, shape index: {}]   ;;  %s2961_s17 = inlined_call_operand.vmem [shape: f32[32,64], index: 17, kind: input, shape index: {}]   ;;  %s2962_s18 = inlined_call_operand.vmem [shape: f32[1,64], index: 18, kind: input, shape index: {}]   ;;  %s2963_s19 = inlined_call_operand.vmem [shape: f32[64,32], index: 19, kind: input, shape index: {}]   ;;  %s2964_s20 = inlined_call_operand.vmem [shape: f32[1,32], index: 20, kind: input, shape index: {}]   ;;  %s2965_s21 = inlined_call_operand.vmem [shape: f32[1,32], index: 21, kind: input, shape index: {}]   ;;  %s2966_s22 = inlined_call_operand.vmem [shape: f32[1,32], index: 22, kind: input, shape index: {}]   ;;  %s2967_s23 = inlined_call_operand.hbm [shape: f32[2,8,32], index: 23, kind: output, shape index: {}]  }
   0x1   :  { %2983 = sst [smem:[#allocation12_spill]] %s2944_s0 }
   0x2   :  { %2984 = sst [smem:[#allocation13_spill]] %s2945_s1 }
   0x3   :  { %2985 = sst [smem:[#allocation14_spill]] %s2946_s2 }
   0x4   :  { %2986 = sst [smem:[#allocation15_spill]] %s2947_s3 }
   0x5   :  { %2987 = sst [smem:[#allocation16_spill]] %s2948_s4 }
   0x6   :  { %2988 = sst [smem:[#allocation17_spill]] %s2949_s5 }
   0x7   :  { %2989 = sst [smem:[#allocation18_spill]] %s2950_s6 }
   0x8   :  { %2990 = sst [smem:[#allocation19_spill]] %s2951_s7 }
   0x9   :  { %2991 = sst [smem:[#allocation20_spill]] %s2952_s8 }
   0xa   :  { %2992 = sst [smem:[#allocation21_spill]] %s2966_s22 }
   0xb   :  { %28 = vsyncpa [#allocation3], 0 }
   0xc   :  { %30 = vsyncpa [#allocation3 + $0x1], 0  ;;  %s2457_s4 = smov 0   ;;  %s2459_s30 = smov 0  }
   0xd   :  { %s2461_s24 = smov 0   ;;  %s2463_s25 = smov 0  }
   0xe LB: > { %2993 = sst [smem:[#allocation5_spill]] %s2320_s4  ;;  %s2478_s5 = sadd.s32 4294967295, %s2332_s25   ;;  %s2332_s25 = sphi %s2463_s25, %s3017_s25   ;;  %s2328_s24 = sphi %s2461_s24, %s3019_s24   ;;  %s2324_s30 = sphi %s2459_s30, %s3021_s30   ;;  %s2320_s4 = sphi %s2457_s4, %s3020_s4  }
   0xf   : > { %2994 = sst [smem:[#allocation6_spill]] %s2328_s24  ;;  %s2088_s1 = sadd.s32 4294967294, %s2332_s25  }
  0x10   : > { %2995 = sst [smem:[#allocation7_spill]] %s2332_s25  ;;  %s2482_s26 = sadd.s32 1, %s2332_s25  }
  0x11   : > { %2996 = sst [smem:[#allocation8_spill]] %s2482_s26  ;;  %s541_s2 = sadd.s32 1, %s2328_s24 }
  0x12   : > { %s538_s6 = ssub.s32 %s2332_s25, %s2482_s26  ;;  %p551_p0 = scmp.ne.s32.totalorder %s2328_s24, %s2324_s30 }
  0x13   : > { %p539_p1 = scmp.eq.s32.totalorder %s538_s6, 0  ;;  %p552_p2 = scmp.eq.s32.totalorder %s2478_s5, 1 }
  0x14   : > { %p557_p3 = scmp.ne.s32.totalorder %s2324_s30, %s2320_s4  ;;  %p558_p4 = scmp.eq.s32.totalorder %s2088_s1, 1 }
  0x15   : > { %s2493_s27 = scalar_select %p539_p1, %s2328_s24, %s541_s2  }
  0x16   : > { %p2495_p5 = por %p552_p2, %p551_p0  ;;  %p2499_p6 = por %p558_p4, %p557_p3 }
  0x17   : > { %2997 = sst [smem:[#allocation9_spill]] %s2493_s27  ;;  %p2091_p7 = scmp.ge.s32.totalorder %s2332_s25, 1 }
  0x18   : > { %s2998_s7 = scalar_select %p2495_p5, 1, 0 }
  0x19   : > { %s3000_s28 = scalar_select %p2499_p6, 1, 0 }
  0x1a   : > { %2999 = sst [smem:[#allocation10_spill]] %s2998_s7  ;;  %p657_p8 = scmp.lt.s32.totalorder %s2332_s25, 3 }
  0x1b   : > { %3001 = sst [smem:[#allocation11_spill]] %s3000_s28 }
  0x1c   : > { %p658_p9 = pnand %p2091_p7, %p657_p8 }
  0x1d   : > { %s3002_s0 = sld [smem:[#allocation15_spill]] (!%p658_p9)  ;;  %p728_p10 = scmp.lt.s32.totalorder (!%p658_p9), %s2478_s5, 1 }
  0x1e   : > { %661 = sbr.rel (%p658_p9) target bundleno = 2922 (0xb6a), region = 112  ;;  %s3003_s2 = sld [smem:[#allocation12_spill]] (!%p658_p9) }
  0x1f   : > { %s3004_s6 = sld [smem:[#allocation16_spill]] (!%p658_p9)  ;;  %s2979_s24 = smov (!%p658_p9), 120  }
  0x20   : > { %s3005_s7 = sld [smem:[#allocation14_spill]] (!%p658_p9)  ;;  %s2335_s26 = smov (!%p658_p9), 112  }
  0x21   : > { %s3006_s29 = sld [smem:[#allocation17_spill]] (!%p658_p9) }
  0x22   : > { %s3007_s28 = sld [smem:[#allocation18_spill]] (!%p658_p9) }
  0x23   : > { %v746_v0 = vld [vmem:[%s3002_s0 + $0x18] sm:$0xff]  ;;  %v745_v2 = vld [vmem:[%s3002_s0 + $0x10] sm:$0xff]  ;;  %v744_v4 = vld [vmem:[%s3002_s0 + $0x8] sm:$0xff]  ;;  %s729_s1 = scalar_select %p728_p10, %s2478_s5, 1  ;;  %vm775_vm0 = vcmask 261120   ;;  %vm867_vm1 = vcmask 64512  }
  0x24   : > { %v750_v1 = vld [vmem:[%s3002_s0 + $0x38] sm:$0xff]  ;;  %791 = vmatpush.msra.mxu0 %v746_v0  ;;  %v749_v3 = vld [vmem:[%s3002_s0 + $0x30] sm:$0xff]  ;;  %v748_v5 = vld [vmem:[%s3002_s0 + $0x28] sm:$0xff]  ;;  %s3009_s8 = sld [smem:[#allocation20_spill]]  ;;  %vm1931_vm9 = vcmask 523264  }
  0x25   : > { %811 = vmatpush.msra.mxu2 %v750_v1  ;;  %v758_v6 = vld [vmem:[%s3002_s0 + $0x78] sm:$0xff]  ;;  %v757_v7 = vld [vmem:[%s3002_s0 + $0x70] sm:$0xff]  ;;  %v743_v8 = vld [vmem:[%s3002_s0] sm:$0xff]  ;;  %s2537_s4 = sshll.u32 %s729_s1, 3  ;;  %s3011_s1 = smov 120  }
  0x26   : > { %792 = vmatpush.msra.mxu0 %v745_v2  ;;  %v747_v9 = vld [vmem:[%s3002_s0 + $0x20] sm:$0xff]  ;;  %851 = vmatpush.msra.mxu3 %v758_v6  ;;  %s731_s22 = scalar_lea.vmem %s3003_s2, %s2537_s4  ;;  %v754_v10 = vld [vmem:[%s3002_s0 + $0x58] sm:$0xff]  ;;  %v756_v11 = vld [vmem:[%s3002_s0 + $0x68] sm:$0xff]  ;;  %s739_s25 = scalar_lea.vmem %s3005_s7, %s2537_s4 }
  0x27   : > { %812 = vmatpush.msra.mxu2 %v749_v3  ;;  %v2549_v12 = vld [vmem:[%s731_s22] sm:$0xff]  ;;  %v753_v13 = vld [vmem:[%s3002_s0 + $0x50] sm:$0xff]  ;;  %v752_v15 = vld [vmem:[%s3002_s0 + $0x48] sm:$0xff]  ;;  %s3010_s22 = sld [smem:[#allocation13_spill]] }
  0x28   : > { %793 = vmatpush.msra.mxu0 %v744_v4  ;;  %852 = vmatpush.msra.mxu3 %v757_v7  ;;  %v755_v14 = vld [vmem:[%s3002_s0 + $0x60] sm:$0xff] }
  0x29   : > { %813 = vmatpush.msra.mxu2 %v748_v5  ;;  %v751_v16 = vld [vmem:[%s3002_s0 + $0x40] sm:$0xff]  ;;  %s3013_s0 = sld [smem:[#allocation21_spill]] }
  0x2a   : > { %794 = vmatpush.msra.mxu0 %v743_v8  ;;  %853 = vmatpush.msra.mxu3 %v756_v11  ;;  %v2208_v17 = vld [vmem:[%s3004_s6] ss:$0 sm:$0xff]  ;;  %v2209_v20 = vld [vmem:[%s3004_s6 + $0x1] ss:$0 sm:$0xff]  ;;  %v2210_v23 = vld [vmem:[%s3004_s6 + $0x2] ss:$0 sm:$0xff] }
  0x2b   : > { %814 = vmatpush.msra.mxu2 %v747_v9  ;;  %2096 = vmatmul.msk.f32.vlgmr.msra.gmra.mxu0 %vm775_vm0, %v2549_v12  ;;  %v2211_v26 = vld [vmem:[%s3004_s6 + $0x3] ss:$0 sm:$0xff] }
  0x2c   : > { %2097 = vmatmul.msk.f32.vlgmr.msra.gmra.mxu2 %vm775_vm0, %v2549_v12  ;;  %854 = vmatpush.msra.mxu3 %v755_v14  ;;  %v742_v33 = vld [vmem:[%s739_s25] sm:$0xff] }
  0x2d   : > { %831 = vmatpush.msrb.mxu2 %v754_v10  ;;  %2099 = vmatmul.msk.f32.vlgmr.msra.gmra.mxu3 %vm775_vm0, %v2549_v12  ;;  %s735_s27 = scalar_lea.vmem %s3010_s22, %s2537_s4  ;;  %s725_s4 = sand.u32 1, %s2324_s30  }
  0x2f   : > { %832 = vmatpush.msrb.mxu2 %v753_v13 }
  0x31   : > { %833 = vmatpush.msrb.mxu2 %v752_v15 }
  0x33   : > { %834 = vmatpush.msrb.mxu2 %v751_v16 }
  0x34   : > { %2098 = vmatmul.msk.f32.vlgmr.msrb.gmra.mxu2 %vm775_vm0, %v2549_v12 }
  0xa8   : > { %v796_v18 = vpop.f32.mrf.mxu0 }
  0xa9   : > { %v797_v19 = vadd.f32 %v2208_v17, %v796_v18 }
  0xab   : > { %865 = vrot.lane.b32.xlu1 %v797_v19, %s2979_s24 }
  0xaf   : > { %v816_v21 = vpop.f32.mrf.mxu2 }
  0xb0   : > { %v817_v22 = vadd.f32 %v2209_v20, %v816_v21  ;;  %v856_v27 = vpop.f32.mrf.mxu3 }
  0xb1   : > { %v2589_v28 = vadd.f32 %v2211_v26, %v856_v27  ;;  %v862_v26 = vld [vmem:[%s3006_s29 + $0x18] sm:$0xff]  ;;  %v859_v27 = vld [vmem:[%s3006_s29] sm:$0xff] }
  0xb2   : > { %v2193_v45 = vpack.i.bf16 %v817_v22, %v797_v19 }
  0xb3   : > { %893 = vrot.lane.b32.xlu1 %v817_v22, %s2979_s24 }
  0xb7   : > { %v836_v24 = vpop.f32.mrf.mxu2 }
  0xb8   : > { %v2582_v25 = vadd.f32 %v2210_v23, %v836_v24  ;;  %v860_v23 = vld [vmem:[%s3006_s29 + $0x8] sm:$0xff] }
  0xba   : > { %920 = vrot.lane.b32.xlu0 %v2582_v25, %s2979_s24  ;;  %v2188_v1 = vpack.i.bf16 %v2589_v28, %v2582_v25 }
  0xc2   : > { %947 = vrot.lane.b32.xlu0 %v2589_v28, %s2979_s24  ;;  %s2143_s24 = sshll.u32 %s2478_s5, 3 }
  0xc3   : > { %s2000_s2 = scalar_lea.hbm %s2967_s23, %s2143_s24 }
 0x11d   : > { %v866_v29 = vpop.permute.xlu1 %865 }
 0x11e   : > { %2100 = vmatpush.xpose.msk.msrb.mxu0 %vm867_vm1, %v866_v29 }
 0x121   : > { %2101 = vmatmul.msk.f32.vlgmr.msrb.gmra.mxu0 %vm867_vm1, %v797_v19 }
 0x125   : > { %v894_v30 = vpop.permute.xlu1 %893 }
 0x126   : > { %2102 = vmatpush.xpose.msk.msra.mxu1 %vm867_vm1, %v894_v30 }
 0x129   : > { %2103 = vmatmul.msk.f32.vlgmr.msra.gmra.mxu1 %vm867_vm1, %v817_v22 }
 0x12c   : > { %v921_v31 = vpop.permute.xlu0 %920 }
 0x12d   : > { %2104 = vmatpush.xpose.msk.msra.mxu2 %vm867_vm1, %v921_v31 }
 0x130   : > { %2105 = vmatmul.msk.f32.vlgmr.msra.gmra.mxu2 %vm867_vm1, %v2582_v25  ;;  %v861_v25 = vld [vmem:[%s3006_s29 + $0x10] sm:$0xff] }
 0x134   : > { %v948_v32 = vpop.permute.xlu0 %947 }
 0x135   : > { %2106 = vmatpush.xpose.msk.msrb.mxu3 %vm867_vm1, %v948_v32 }
 0x138   : > { %2107 = vmatmul.msk.f32.vlgmr.msrb.gmra.mxu3 %vm867_vm1, %v2589_v28 }
 0x19e   : > { %v889_v34 = vpop.f32.mrf.mxu0 }
 0x19f   : > { %v890_v35 = vadd.f32 %v889_v34, %v742_v33 }
 0x1a1   : > { %v973_v36 = vsel %vm867_vm1, %v890_v35, -inf }
 0x1a2   : > { %974 = vmax.xlane.f32.xlu0 %v973_v36 }
 0x1a6   : > { %v916_v37 = vpop.f32.mrf.mxu1 }
 0x1a7   : > { %v917_v38 = vadd.f32 %v916_v37, %v742_v33 }
 0x1a9   : > { %v976_v39 = vsel %vm867_vm1, %v917_v38, -inf }
 0x1aa   : > { %977 = vmax.xlane.f32.xlu1 %v976_v39 }
 0x1b3   : > { %v943_v43 = vpop.f32.mrf.mxu2 }
 0x1b4   : > { %v944_v44 = vadd.f32 %v943_v43, %v742_v33 }
 0x1b6   : > { %v979_v46 = vsel %vm867_vm1, %v944_v44, -inf }
 0x1bb   : > { %v970_v40 = vpop.f32.mrf.mxu3 }
 0x1bc   : > { %v971_v41 = vadd.f32 %v970_v40, %v742_v33  ;;  %v2212_v40 = vld [vmem:[%s3007_s28] ss:$0 sm:$0xff]  ;;  %s1990_s28 = scalar_lea.sflag [#allocation3], %s725_s4 }
 0x1be   : > { %v982_v42 = vsel %vm867_vm1, %v971_v41, -inf }
 0x1bf   : > { %983 = vmax.xlane.f32.xlu2 %v982_v42 }
 0x1c3   : > { %2194 = vrot.lane.b32.xlu1 %v2193_v45, %s2335_s26 }
 0x1c7   : > { %980 = vmax.xlane.f32.xlu2 %v979_v46  ;;  %v2336_v46 = vmov 32.0  }
 0x215   : > { %v975_v2 = vpop.xlane.xlu0 %974 }
 0x216   : > { %v985_v3 = vsub.f32 %v890_v35, %v975_v2  ;;  %v1269_v2 = vld [vmem:[%s2953_s9 + $0x28] sm:$0xff] }
 0x218   : > { %v989_v4 = vmul.f32 1.442695, %v985_v3  ;;  %v1273_v3 = vld [vmem:[%s2953_s9 + $0x48] sm:$0xff] }
 0x21d   : > { %v978_v47 = vpop.xlane.xlu1 %977 }
 0x21e   : > { %v986_v48 = vsub.f32 %v917_v38, %v978_v47 }
 0x220   : > { %v991_v49 = vmul.f32 1.442695, %v986_v48 }
 0x222   : > { %2230 = vpow2.f32 %v991_v49 }
 0x228   : > { %v2231_v50 = vpop.eup %2230 }
 0x229   : > { %v1000_v51 = vsel %vm867_vm1, %v2231_v50, 0.0 }
 0x22a   : > { %1001 = vadd.xlane.f32.xlu0 %v1000_v51 }
 0x232   : > { %v984_v52 = vpop.xlane.xlu2 %983 }
 0x233   : > { %v988_v53 = vsub.f32 %v971_v41, %v984_v52 }
 0x235   : > { %v995_v54 = vmul.f32 1.442695, %v988_v53  ;;  %v2195_v55 = vpop.permute.xlu1 %2194 }
 0x236   : > { %v2196_v56 = vunpack.i.l.bf16 %v2195_v55  ;;  %v2197_v57 = vunpack.i.h.bf16 %v2195_v55 }
 0x237   : > { %2232 = vpow2.f32 %v995_v54 }
 0x238   : > { %1038 = vmatpush.msra.mxu0 %v2196_v56  ;;  %1064 = vmatpush.msrb.mxu1 %v2197_v57  ;;  %v1267_v57 = vld [vmem:[%s2953_s9 + $0x18] sm:$0xff] }
 0x23a   : > { %v981_v58 = vpop.xlane.xlu2 %980  ;;  %1162 = vmatpush.msra.mxu1 %v860_v23  ;;  %1139 = vmatpush.msrb.mxu0 %v859_v27  ;;  %v1392_v23 = vld [vmem:[%s2955_s11 + $0x68] sm:$0xff]  ;;  %v1387_v27 = vld [vmem:[%s2955_s11 + $0x40] sm:$0xff] }
 0x23b   : > { %v987_v59 = vsub.f32 %v944_v44, %v981_v58  ;;  %v1271_v58 = vld [vmem:[%s2953_s9 + $0x38] sm:$0xff] }
 0x23d   : > { %v2233_v60 = vpop.eup %2232  ;;  %v993_v61 = vmul.f32 1.442695, %v987_v59  ;;  %v1275_v59 = vld [vmem:[%s2953_s9 + $0x58] sm:$0xff] }
 0x23e   : > { %v1006_v62 = vsel %vm867_vm1, %v2233_v60, 0.0 }
 0x23f   : > { %2234 = vpow2.f32 %v993_v61  ;;  %1007 = vadd.xlane.f32.xlu2 %v1006_v62  ;;  %v1266_v61 = vld [vmem:[%s2953_s9 + $0x10] sm:$0xff] }
 0x240   : > { %2236 = vpow2.f32 %v989_v4  ;;  %v1270_v62 = vld [vmem:[%s2953_s9 + $0x30] sm:$0xff]  ;;  %v1277_v4 = vld [vmem:[%s2953_s9 + $0x68] sm:$0xff] }
 0x245   : > { %v2235_v63 = vpop.eup %2234 }
 0x246   : > { %v1003_v0 = vsel %vm867_vm1, %v2235_v63, 0.0  ;;  %v2237_v5 = vpop.eup %2236 }
 0x247   : > { %1004 = vadd.xlane.f32.xlu2 %v1003_v0  ;;  %v997_v6 = vsel %vm867_vm1, %v2237_v5, 0.0  ;;  %v1278_v0 = vld [vmem:[%s2953_s9 + $0x70] sm:$0xff] }
 0x25f   : > { %2189 = vrot.lane.b32.xlu2 %v2188_v1, %s2335_s26  ;;  %v1265_v1 = vld [vmem:[%s2953_s9 + $0x8] sm:$0xff]  ;;  %s3008_s26 = sld [smem:[#allocation19_spill]] }
 0x288   : > { %998 = vadd.xlane.f32.xlu2 %v997_v6  ;;  %v1268_v6 = vld [vmem:[%s2953_s9 + $0x20] sm:$0xff] }
 0x29d   : > { %v1002_v7 = vpop.xlane.xlu0 %1001 }
 0x29e   : > { %2238 = vrcp.f32 %v1002_v7  ;;  %v1272_v7 = vld [vmem:[%s2953_s9 + $0x40] sm:$0xff] }
 0x2a4   : > { %v2239_v8 = vpop.eup %2238 }
 0x2a5   : > { %v1014_v9 = vmul.f32 %v2239_v8, %v2231_v50  ;;  %v1276_v8 = vld [vmem:[%s2953_s9 + $0x60] sm:$0xff] }
 0x2a7   : > { %2109 = vmatmul.msk.f32.vlgmr.msrb.gmra.mxu1 %vm867_vm1, %v1014_v9  ;;  %v1382_v9 = vld [vmem:[%s2955_s11 + $0x18] sm:$0xff] }
 0x2a8   : > { %1331 = vmatpush.msrb.mxu1 %v1271_v58  ;;  %v2222_v58 = vld [vmem:[%s2956_s12 + $0x3] ss:$0 sm:$0xff] }
 0x2aa   : > { %1332 = vmatpush.msrb.mxu1 %v1270_v62 }
 0x2ac   : > { %1333 = vmatpush.msrb.mxu1 %v1269_v2 }
 0x2ae   : > { %1334 = vmatpush.msrb.mxu1 %v1268_v6 }
 0x2b2   : > { %v1008_v10 = vpop.xlane.xlu2 %1007 }
 0x2b3   : > { %2240 = vrcp.f32 %v1008_v10  ;;  %v1386_v10 = vld [vmem:[%s2955_s11 + $0x38] sm:$0xff] }
 0x2b9   : > { %v2241_v13 = vpop.eup %2240 }
 0x2ba   : > { %v1005_v11 = vpop.xlane.xlu2 %1004  ;;  %v1016_v18 = vmul.f32 %v2241_v13, %v2233_v60  ;;  %v1279_v60 = vld [vmem:[%s2953_s9 + $0x78] sm:$0xff] }
 0x2bb   : > { %2242 = vrcp.f32 %v1005_v11  ;;  %v1390_v11 = vld [vmem:[%s2955_s11 + $0x58] sm:$0xff] }
 0x2bc   : > { %v1394_v13 = vld [vmem:[%s2955_s11 + $0x78] sm:$0xff] }
 0x2c1   : > { %v2243_v14 = vpop.eup %2242 }
 0x2c2   : > { %v2190_v15 = vpop.permute.xlu2 %2189  ;;  %v1015_v19 = vmul.f32 %v2243_v14, %v2235_v63  ;;  %v1274_v63 = vld [vmem:[%s2953_s9 + $0x50] sm:$0xff] }
 0x2c3   : > { %v2192_v16 = vunpack.i.h.bf16 %v2190_v15  ;;  %v2191_v17 = vunpack.i.l.bf16 %v2190_v15  ;;  %v1381_v14 = vld [vmem:[%s2955_s11 + $0x10] sm:$0xff] }
 0x2c4   : > { %v1385_v15 = vld [vmem:[%s2955_s11 + $0x30] sm:$0xff] }
 0x2c5   : > { %1090 = vmatpush.msrb.mxu2 %v2191_v17  ;;  %1116 = vmatpush.msra.mxu3 %v2192_v16  ;;  %v1389_v17 = vld [vmem:[%s2955_s11 + $0x50] sm:$0xff] }
 0x2c6   : > { %2110 = vmatmul.msk.f32.vlgmr.msrb.gmra.mxu2 %vm867_vm1, %v1015_v19  ;;  %2111 = vmatmul.msk.f32.vlgmr.msra.gmra.mxu3 %vm867_vm1, %v1016_v18  ;;  %v1393_v18 = vld [vmem:[%s2955_s11 + $0x70] sm:$0xff]  ;;  %v1380_v19 = vld [vmem:[%s2955_s11 + $0x8] sm:$0xff] }
 0x2c7   : > { %1185 = vmatpush.msra.mxu2 %v861_v25  ;;  %1208 = vmatpush.msrb.mxu3 %v862_v26  ;;  %v1383_v25 = vld [vmem:[%s2955_s11 + $0x20] sm:$0xff] }
 0x2c9   : > { %1351 = vmatpush.msrb.mxu2 %v1275_v59  ;;  %1371 = vmatpush.msra.mxu3 %v1279_v60  ;;  %v2217_v59 = vld [vmem:[%s2954_s10 + $0x2] ss:$0 sm:$0xff]  ;;  %v2218_v60 = vld [vmem:[%s2954_s10 + $0x3] ss:$0 sm:$0xff] }
 0x2cb   : > { %1352 = vmatpush.msrb.mxu2 %v1274_v63  ;;  %1372 = vmatpush.msra.mxu3 %v1278_v0 }
 0x2cd   : > { %1353 = vmatpush.msrb.mxu2 %v1273_v3  ;;  %1373 = vmatpush.msra.mxu3 %v1277_v4 }
 0x2cf   : > { %1354 = vmatpush.msrb.mxu2 %v1272_v7  ;;  %1374 = vmatpush.msra.mxu3 %v1276_v8 }
 0x2fb   : > { %v999_v20 = vpop.xlane.xlu2 %998 }
 0x2fc   : > { %2244 = vrcp.f32 %v999_v20 }
 0x2fd   : > { %2246 = vrcp.f32 %v2336_v46 }
 0x302   : > { %v2245_v21 = vpop.eup %2244 }
 0x303   : > { %v1013_v22 = vmul.f32 %v2245_v21, %v2237_v5  ;;  %v2247_v47 = vpop.eup %2246  ;;  %v1264_v5 = vld [vmem:[%s2953_s9] sm:$0xff]  ;;  %v1384_v21 = vld [vmem:[%s2955_s11 + $0x28] sm:$0xff] }
 0x304   : > { %v1231_v48 = vmul.f32 32.0, %v2247_v47  ;;  %vm1235_vm2 = vweird.f32 %v2247_v47 }
 0x305   : > { %2108 = vmatmul.msk.f32.vlgmr.msra.gmra.mxu0 %vm867_vm1, %v1013_v22  ;;  %v1388_v22 = vld [vmem:[%s2955_s11 + $0x48] sm:$0xff] }
 0x306   : > { %v1232_v49 = vsub.f32 1.0, %v1231_v48  ;;  %1311 = vmatpush.msra.mxu0 %v1267_v57  ;;  %v2215_v48 = vld [vmem:[%s2954_s10] ss:$0 sm:$0xff]  ;;  %v2221_v57 = vld [vmem:[%s2956_s12 + $0x2] ss:$0 sm:$0xff] }
 0x308   : > { %v1233_v50 = vmul.f32 %v2247_v47, %v1232_v49  ;;  %1312 = vmatpush.msra.mxu0 %v1266_v61  ;;  %v2216_v49 = vld [vmem:[%s2954_s10 + $0x1] ss:$0 sm:$0xff] }
 0x30a   : > { %v1234_v51 = vadd.f32 %v2247_v47, %v1233_v50  ;;  %1313 = vmatpush.msra.mxu0 %v1265_v1 }
 0x30c   : > { %v2648_v52 = vsel %vm1235_vm2, %v2247_v47, %v1234_v51  ;;  %1314 = vmatpush.msra.mxu0 %v1264_v5 }
 0x324   : > { %v1066_v24 = vpop.f32.mrf.mxu1 }
 0x325   : > { %2113 = vmatmul.msk.f32.vlgmr.msra.gmra.mxu1 %vm867_vm1, %v1066_v24  ;;  %v1379_v24 = vld [vmem:[%s2955_s11] sm:$0xff] }
 0x326   : > { %1446 = vmatpush.msra.mxu1 %v1386_v10 }
 0x328   : > { %1447 = vmatpush.msra.mxu1 %v1385_v15 }
 0x32a   : > { %1448 = vmatpush.msra.mxu1 %v1384_v21 }
 0x32c   : > { %1449 = vmatpush.msra.mxu1 %v1383_v25 }
 0x349   : > { %v1092_v28 = vpop.f32.mrf.mxu2  ;;  %v1118_v29 = vpop.f32.mrf.mxu3 }
 0x34a   : > { %2114 = vmatmul.msk.f32.vlgmr.msra.gmra.mxu2 %vm867_vm1, %v1092_v28  ;;  %2115 = vmatmul.msk.f32.vlgmr.msrb.gmra.mxu3 %vm867_vm1, %v1118_v29  ;;  %v1391_v28 = vld [vmem:[%s2955_s11 + $0x60] sm:$0xff] }
 0x34b   : > { %1466 = vmatpush.msra.mxu2 %v1390_v11  ;;  %1486 = vmatpush.msrb.mxu3 %v1394_v13 }
 0x34d   : > { %1467 = vmatpush.msra.mxu2 %v1389_v17  ;;  %1487 = vmatpush.msrb.mxu3 %v1393_v18 }
 0x34f   : > { %1468 = vmatpush.msra.mxu2 %v1388_v22  ;;  %1488 = vmatpush.msrb.mxu3 %v1392_v23 }
 0x351   : > { %1469 = vmatpush.msra.mxu2 %v1387_v27  ;;  %1489 = vmatpush.msrb.mxu3 %v1391_v28 }
 0x382   : > { %v1040_v30 = vpop.f32.mrf.mxu0 }
 0x383   : > { %2112 = vmatmul.msk.f32.vlgmr.msrb.gmra.mxu0 %vm867_vm1, %v1040_v30 }
 0x384   : > { %1426 = vmatpush.msrb.mxu0 %v1382_v9 }
 0x386   : > { %1427 = vmatpush.msrb.mxu0 %v1381_v14 }
 0x388   : > { %1428 = vmatpush.msrb.mxu0 %v1380_v19 }
 0x38a   : > { %1429 = vmatpush.msrb.mxu0 %v1379_v24 }
 0x3a2   : > { %v1164_v31 = vpop.f32.mrf.mxu1 }
 0x3a3   : > { %v1214_v34 = vsel %vm775_vm0, %v1164_v31, 0.0 }
 0x3cd   : > { %v1187_v32 = vpop.f32.mrf.mxu2  ;;  %v1210_v36 = vpop.f32.mrf.mxu3 }
 0x3ce   : > { %v1216_v38 = vsel %vm775_vm0, %v1187_v32, 0.0  ;;  %v1218_v41 = vsel %vm775_vm0, %v1210_v36, 0.0 }
 0x400   : > { %v1141_v33 = vpop.f32.mrf.mxu0 }
 0x401   : > { %v1213_v35 = vsel %vm775_vm0, %v1141_v33, 0.0 }
 0x402   : > { %v1215_v37 = vadd.f32 %v1214_v34, %v1213_v35  ;;  %v2213_v35 = vld [vmem:[%s3008_s26] ss:$0 sm:$0xff] }
 0x404   : > { %v1217_v39 = vadd.f32 %v1216_v38, %v1215_v37  ;;  %v2214_v38 = vld [vmem:[%s3009_s8] ss:$0 sm:$0xff]  ;;  %s2004_s8 = sshll.u32 %s2000_s2, 4  ;;  %s2005_s8 = int_to_ptr.hbm [resolvable:$true] %s2004_s8 }
 0x405   : > { %s2284_s3 = sshra.s32 %s2005_s8, 4  ;;  %s2285_s3 = int_to_ptr.hbm [resolvable:$true] %s2284_s3 }
 0x406   : > { %v1219_v42 = vadd.f32 %v1218_v41, %v1217_v39  ;;  %v741_v41 = vld [vmem:[%s735_s27] sm:$0xff]  ;;  %s2286_s24 = scalar_lea.hbm %s2285_s3, 8  ;;  %p2291_p0 = scmp.lt.s32.totalorder %s2285_s3, %s2967_s23 }
 0x407   : > { %p2287_p11 = scmp.ne.s32.totalorder %s2285_s3, %s2286_s24 }
 0x408   : > { %v1223_v43 = vadd.f32 %v2212_v40, %v1219_v42 }
 0x409   : > { %p2288_p12 = pnand %p2287_p11, %p2495_p5 }
 0x40a   : > { %v1224_v44 = vadd.f32 %v1223_v43, %v2549_v12 }
 0x40b   : > { %p2289_p13 = pneg %p2288_p12 }
 0x40c   : > { %v1227_v45 = vsel %vm775_vm0, %v1224_v44, 0.0 }
 0x40d   : > { %1228 = vadd.xlane.f32.xlu0 %v1227_v45  ;;  %v2220_v45 = vld [vmem:[%s2956_s12 + $0x1] ss:$0 sm:$0xff] }
 0x480   : > { %v1229_v53 = vpop.xlane.xlu0 %1228 }
 0x481   : > { %v1237_v54 = vmul.f32 %v2648_v52, %v1229_v53 }
 0x483   : > { %v2651_v55 = vsub.f32 %v1224_v44, %v1237_v54  ;;  %v2219_v44 = vld [vmem:[%s2956_s12] ss:$0 sm:$0xff] }
 0x485   : > { %v1239_v12 = vmul.f32 %v2651_v55, %v2651_v55 }
 0x487   : > { %v1240_v56 = vsel %vm775_vm0, %v1239_v12, 0.0 }
 0x488   : > { %1241 = vadd.xlane.f32.xlu0 %v1240_v56 }
 0x4fb   : > { %v1242_v16 = vpop.xlane.xlu0 %1241 }
 0x4fc   : > { %v1243_v20 = vmul.f32 %v1242_v16, %v2648_v52 }
 0x4fe   : > { %v1244_v26 = vadd.f32 1e-05, %v1243_v20 }
 0x500   : > { %2248 = vrsqrt.f32 %v1244_v26  ;;  %vm1251_vm4 = vweird.f32 %v1244_v26 }
 0x506   : > { %v2249_v29 = vpop.eup %2248 }
 0x507   : > { %v1246_v30 = vmul.f32 %v2249_v29, %v1244_v26  ;;  %vm1252_vm3 = vweird.f32 %v2249_v29 }
 0x508   : > { %vm1253_vm5 = vmor %vm1251_vm4, %vm1252_vm3 }
 0x509   : > { %v1247_v31 = vmul.f32 %v2249_v29, %v1246_v30 }
 0x50b   : > { %v1248_v32 = vmul.f32 0.5, %v1247_v31 }
 0x50d   : > { %v1249_v33 = vsub.f32 1.5, %v1248_v32 }
 0x50f   : > { %v1250_v34 = vmul.f32 %v2249_v29, %v1249_v33 }
 0x511   : > { %v1254_v36 = vsel %vm1253_vm5, %v2249_v29, %v1250_v34 }
 0x512   : > { %v1255_v37 = vmul.f32 %v1254_v36, %v2651_v55 }
 0x514   : > { %v1259_v39 = vmul.f32 %v2213_v35, %v1255_v37 }
 0x516   : > { %v2760_v40 = vadd.f32 %v2214_v38, %v1259_v39 }
 0x518   : > { %2116 = vmatmul.msk.f32.vlgmr.msra.gmra.mxu0 %vm775_vm0, %v2760_v40  ;;  %2117 = vmatmul.msk.f32.vlgmr.msrb.gmra.mxu1 %vm775_vm0, %v2760_v40 }
 0x519   : > { %2118 = vmatmul.msk.f32.vlgmr.msrb.gmra.mxu2 %vm775_vm0, %v2760_v40  ;;  %2119 = vmatmul.msk.f32.vlgmr.msra.gmra.mxu3 %vm775_vm0, %v2760_v40 }
 0x520   : > { %2120 = vmatmul.msk.f32.vlgmr.msrb.gmra.mxu0 %vm775_vm0, %v741_v41  ;;  %2121 = vmatmul.msk.f32.vlgmr.msra.gmra.mxu1 %vm775_vm0, %v741_v41 }
 0x521   : > { %2122 = vmatmul.msk.f32.vlgmr.msra.gmra.mxu2 %vm775_vm0, %v741_v41  ;;  %2123 = vmatmul.msk.f32.vlgmr.msrb.gmra.mxu3 %vm775_vm0, %v741_v41 }
 0x595   : > { %v1316_v42 = vpop.f32.mrf.mxu0  ;;  %v1336_v43 = vpop.f32.mrf.mxu1 }
 0x596   : > { %v1317_v12 = vadd.f32 %v2215_v48, %v1316_v42  ;;  %v1337_v56 = vadd.f32 %v2216_v49, %v1336_v43 }
 0x59c   : > { %v1356_v46 = vpop.f32.mrf.mxu2  ;;  %v1376_v47 = vpop.f32.mrf.mxu3 }
 0x59d   : > { %v1431_v50 = vpop.f32.mrf.mxu0  ;;  %v1451_v51 = vpop.f32.mrf.mxu1  ;;  %v1357_v2 = vadd.f32 %v2217_v59, %v1356_v46  ;;  %v1377_v3 = vadd.f32 %v2218_v60, %v1376_v47 }
 0x59e   : > { %v1432_v53 = vadd.f32 %v2219_v44, %v1431_v50  ;;  %v1452_v54 = vadd.f32 %v2220_v45, %v1451_v51 }
 0x5a0   : > { %v2203_v55 = vpack.i.bf16 %v1452_v54, %v1432_v53  ;;  %2124 = vmatpush.xpose.msk.msra.mxu0 %vm867_vm1, %v1432_v53  ;;  %2126 = vmatpush.xpose.msk.msrb.mxu1 %vm867_vm1, %v1452_v54  ;;  %v1494_v53 = vld [vmem:[%s2957_s13] sm:$0xff]  ;;  %v1496_v54 = vld [vmem:[%s2957_s13 + $0x10] sm:$0xff] }
 0x5a3   : > { %2125 = vmatmul.msk.f32.vlgmr.msra.gmra.mxu0 %vm867_vm1, %v1317_v12  ;;  %2127 = vmatmul.msk.f32.vlgmr.msrb.gmra.mxu1 %vm867_vm1, %v1337_v56  ;;  %v1495_v12 = vld [vmem:[%s2957_s13 + $0x8] sm:$0xff] }
 0x5a4   : > { %v1471_v61 = vpop.f32.mrf.mxu2  ;;  %v1491_v62 = vpop.f32.mrf.mxu3 }
 0x5a5   : > { %v1472_v63 = vadd.f32 %v2221_v57, %v1471_v61  ;;  %v1492_v0 = vadd.f32 %v2222_v58, %v1491_v62 }
 0x5a7   : > { %v2198_v1 = vpack.i.bf16 %v1492_v0, %v1472_v63  ;;  %2128 = vmatpush.xpose.msk.msrb.mxu2 %vm867_vm1, %v1472_v63  ;;  %2130 = vmatpush.xpose.msk.msra.mxu3 %vm867_vm1, %v1492_v0 }
 0x5aa   : > { %2129 = vmatmul.msk.f32.vlgmr.msrb.gmra.mxu2 %vm867_vm1, %v1357_v2  ;;  %2131 = vmatmul.msk.f32.vlgmr.msra.gmra.mxu3 %vm867_vm1, %v1377_v3 }
 0x620   : > { %v1548_v4 = vpop.f32.mrf.mxu1  ;;  %v1522_v10 = vpop.f32.mrf.mxu0 }
 0x621   : > { %v1606_v5 = vsel %vm867_vm1, %v1548_v4, -inf  ;;  %v1603_v11 = vsel %vm867_vm1, %v1522_v10, -inf }
 0x622   : > { %1607 = vmax.xlane.f32.xlu2 %v1606_v5  ;;  %v2223_v5 = vld [vmem:[%s2958_s14] ss:$0 sm:$0xff] }
 0x62d   : > { %v1574_v6 = vpop.f32.mrf.mxu2  ;;  %v1600_v7 = vpop.f32.mrf.mxu3 }
 0x62e   : > { %v1612_v8 = vsel %vm867_vm1, %v1600_v7, -inf  ;;  %v1609_v9 = vsel %vm867_vm1, %v1574_v6, -inf }
 0x62f   : > { %1613 = vmax.xlane.f32.xlu1 %v1612_v8  ;;  %1610 = vmax.xlane.f32.xlu0 %v1609_v9 }
 0x637   : > { %1604 = vmax.xlane.f32.xlu0 %v1603_v11 }
 0x648   : > { %2204 = vrot.lane.b32.xlu1 %v2203_v55, %s3011_s1  ;;  %v1497_v55 = vld [vmem:[%s2957_s13 + $0x18] sm:$0xff] }
 0x695   : > { %v1608_v24 = vpop.xlane.xlu2 %1607 }
 0x696   : > { %v1616_v26 = vsub.f32 %v1548_v4, %v1608_v24 }
 0x698   : > { %v1621_v28 = vmul.f32 1.442695, %v1616_v26 }
 0x6a2   : > { %v1611_v13 = vpop.xlane.xlu0 %1610  ;;  %v1614_v16 = vpop.xlane.xlu1 %1613 }
 0x6a3   : > { %v1617_v14 = vsub.f32 %v1574_v6, %v1611_v13  ;;  %v1618_v19 = vsub.f32 %v1600_v7, %v1614_v16 }
 0x6a5   : > { %v1623_v15 = vmul.f32 1.442695, %v1617_v14  ;;  %v1625_v23 = vmul.f32 1.442695, %v1618_v19  ;;  %v1887_v19 = vld [vmem:[%s2961_s17] sm:$0xff] }
 0x6a7   : > { %2250 = vpow2.f32 %v1623_v15 }
 0x6aa   : > { %v1605_v17 = vpop.xlane.xlu0 %1604 }
 0x6ab   : > { %v1615_v18 = vsub.f32 %v1522_v10, %v1605_v17  ;;  %v1890_v17 = vld [vmem:[%s2961_s17 + $0x18] sm:$0xff] }
 0x6ad   : > { %v1619_v20 = vmul.f32 1.442695, %v1615_v18  ;;  %v2251_v21 = vpop.eup %2250  ;;  %v1888_v18 = vld [vmem:[%s2961_s17 + $0x8] sm:$0xff] }
 0x6ae   : > { %v1633_v22 = vsel %vm867_vm1, %v2251_v21, 0.0 }
 0x6af   : > { %2252 = vpow2.f32 %v1619_v20  ;;  %1634 = vadd.xlane.f32.xlu0 %v1633_v22  ;;  %v1926_v20 = vld [vmem:[%s2963_s19 + $0x38] sm:$0xff]  ;;  %v1924_v22 = vld [vmem:[%s2963_s19 + $0x28] sm:$0xff] }
 0x6b0   : > { %2254 = vpow2.f32 %v1625_v23 }
 0x6b1   : > { %2256 = vpow2.f32 %v1621_v28 }
 0x6b5   : > { %v2253_v25 = vpop.eup %2252 }
 0x6b6   : > { %v1627_v27 = vsel %vm867_vm1, %v2253_v25, 0.0  ;;  %v2255_v30 = vpop.eup %2254 }
 0x6b7   : > { %1628 = vadd.xlane.f32.xlu2 %v1627_v27  ;;  %v1636_v33 = vsel %vm867_vm1, %v2255_v30, 0.0  ;;  %v2257_v34 = vpop.eup %2256  ;;  %v1922_v27 = vld [vmem:[%s2963_s19 + $0x18] sm:$0xff] }
 0x6b8   : > { %v1630_v35 = vsel %vm867_vm1, %v2257_v34, 0.0 }
 0x6ba   : > { %v2205_v29 = vpop.permute.xlu1 %2204 }
 0x6bb   : > { %v2207_v31 = vunpack.i.h.bf16 %v2205_v29  ;;  %v2206_v32 = vunpack.i.l.bf16 %v2205_v29 }
 0x6bd   : > { %1668 = vmatpush.msrb.mxu0 %v2206_v32  ;;  %1694 = vmatpush.msra.mxu1 %v2207_v31 }
 0x6bf   : > { %1637 = vadd.xlane.f32.xlu2 %v1636_v33  ;;  %1769 = vmatpush.msra.mxu0 %v1494_v53 }
 0x6c0   : > { %1792 = vmatpush.msrb.mxu1 %v1495_v12 }
 0x6c3   : > { %2199 = vrot.lane.b32.xlu0 %v2198_v1, %s3011_s1  ;;  %s2092_s1 = sshll.u32 %s725_s4, 3 }
 0x6c4   : > { %s727_s6 = scalar_lea.vmem [#allocation2], %s2092_s1 }
 0x6c5   : > { %s2002_s5 = sshll.u32 %s727_s6, 4  ;;  %s2003_s5 = int_to_ptr.vmem [resolvable:$true] %s2002_s5 }
 0x6c7   : > { %1631 = vadd.xlane.f32.xlu2 %v1630_v35 }
 0x722   : > { %v1635_v37 = vpop.xlane.xlu0 %1634 }
 0x72a   : > { %v1629_v36 = vpop.xlane.xlu2 %1628 }
 0x72b   : > { %2258 = vrcp.f32 %v1629_v36 }
 0x72c   : > { %2260 = vrcp.f32 %v1635_v37  ;;  %v2225_v37 = vld [vmem:[%s2960_s16] ss:$0 sm:$0xff] }
 0x731   : > { %v2259_v38 = vpop.eup %2258 }
 0x732   : > { %v1643_v39 = vmul.f32 %v2259_v38, %v2253_v25  ;;  %v1638_v41 = vpop.xlane.xlu2 %1637  ;;  %v2261_v42 = vpop.eup %2260  ;;  %v1923_v25 = vld [vmem:[%s2963_s19 + $0x20] sm:$0xff] }
 0x733   : > { %2262 = vrcp.f32 %v1638_v41  ;;  %v1645_v46 = vmul.f32 %v2261_v42, %v2251_v21  ;;  %v1925_v21 = vld [vmem:[%s2963_s19 + $0x30] sm:$0xff]  ;;  %v1920_v42 = vld [vmem:[%s2963_s19 + $0x8] sm:$0xff] }
 0x734   : > { %2132 = vmatmul.msk.f32.vlgmr.msrb.gmra.mxu0 %vm867_vm1, %v1643_v39  ;;  %v1921_v41 = vld [vmem:[%s2963_s19 + $0x10] sm:$0xff] }
 0x735   : > { %v2200_v43 = vpop.permute.xlu0 %2199  ;;  %1910 = vmatpush.msrb.mxu0 %v1890_v17 }
 0x736   : > { %v2202_v44 = vunpack.i.h.bf16 %v2200_v43  ;;  %v2201_v45 = vunpack.i.l.bf16 %v2200_v43  ;;  %v1919_v43 = vld [vmem:[%s2963_s19] sm:$0xff] }
 0x738   : > { %1720 = vmatpush.msra.mxu2 %v2201_v45  ;;  %1746 = vmatpush.msrb.mxu3 %v2202_v44  ;;  %v2226_v44 = vld [vmem:[%s2962_s18] ss:$0 sm:$0xff] }
 0x739   : > { %v2263_v47 = vpop.eup %2262  ;;  %2134 = vmatmul.msk.f32.vlgmr.msra.gmra.mxu2 %vm867_vm1, %v1645_v46 }
 0x73a   : > { %v1646_v48 = vmul.f32 %v2263_v47, %v2255_v30  ;;  %v1632_v49 = vpop.xlane.xlu2 %1631  ;;  %1815 = vmatpush.msrb.mxu2 %v1496_v54  ;;  %1838 = vmatpush.msra.mxu3 %v1497_v55 }
 0x73b   : > { %2264 = vrcp.f32 %v1632_v49 }
 0x73c   : > { %2135 = vmatmul.msk.f32.vlgmr.msrb.gmra.mxu3 %vm867_vm1, %v1646_v48  ;;  %v2227_v48 = vld [vmem:[%s2964_s20] ss:$0 sm:$0xff] }
 0x741   : > { %v2265_v50 = vpop.eup %2264 }
 0x742   : > { %v1644_v51 = vmul.f32 %v2265_v50, %v2257_v34  ;;  %v2224_v34 = vld [vmem:[%s2959_s15] ss:$0 sm:$0xff] }
 0x744   : > { %2133 = vmatmul.msk.f32.vlgmr.msra.gmra.mxu1 %vm867_vm1, %v1644_v51 }
 0x745   : > { %1943 = vmatpush.msra.mxu1 %v1926_v20 }
 0x747   : > { %1944 = vmatpush.msra.mxu1 %v1925_v21 }
 0x749   : > { %1945 = vmatpush.msra.mxu1 %v1924_v22 }
 0x74b   : > { %1946 = vmatpush.msra.mxu1 %v1923_v25 }
 0x74d   : > { %1947 = vmatpush.msra.mxu1 %v1922_v27 }
 0x74f   : > { %1948 = vmatpush.msra.mxu1 %v1921_v41 }
 0x751   : > { %1949 = vmatpush.msra.mxu1 %v1920_v42 }
 0x753   : > { %1950 = vmatpush.msra.mxu1 %v1919_v43 }
 0x7b1   : > { %v1670_v56 = vpop.f32.mrf.mxu0 }
 0x7b2   : > { %2136 = vmatmul.msk.f32.vlgmr.msra.gmra.mxu0 %vm867_vm1, %v1670_v56 }
 0x7bc   : > { %v1722_v57 = vpop.f32.mrf.mxu2 }
 0x7bd   : > { %2138 = vmatmul.msk.f32.vlgmr.msrb.gmra.mxu2 %vm867_vm1, %v1722_v57 }
 0x7bf   : > { %v1748_v58 = vpop.f32.mrf.mxu3 }
 0x7c0   : > { %2139 = vmatmul.msk.f32.vlgmr.msra.gmra.mxu3 %vm867_vm1, %v1748_v58 }
 0x7c1   : > { %v1696_v59 = vpop.f32.mrf.mxu1 }
 0x7c2   : > { %2137 = vmatmul.msk.f32.vlgmr.msrb.gmra.mxu1 %vm867_vm1, %v1696_v59 }
 0x82f   : > { %v1771_v60 = vpop.f32.mrf.mxu0 }
 0x830   : > { %v1843_v62 = vsel %vm775_vm0, %v1771_v60, 0.0 }
 0x83f   : > { %v1794_v61 = vpop.f32.mrf.mxu1 }
 0x840   : > { %v1844_v63 = vsel %vm775_vm0, %v1794_v61, 0.0  ;;  %v1817_v1 = vpop.f32.mrf.mxu2 }
 0x841   : > { %v1845_v0 = vadd.f32 %v1844_v63, %v1843_v62  ;;  %v1846_v2 = vsel %vm775_vm0, %v1817_v1, 0.0 }
 0x843   : > { %v1847_v3 = vadd.f32 %v1846_v2, %v1845_v0  ;;  %v1840_v4 = vpop.f32.mrf.mxu3 }
 0x844   : > { %v1848_v6 = vsel %vm775_vm0, %v1840_v4, 0.0 }
 0x845   : > { %v1849_v7 = vadd.f32 %v1848_v6, %v1847_v3  ;;  %v2228_v3 = vld [vmem:[%s2965_s21] ss:$0 sm:$0xff] }
 0x847   : > { %v1853_v8 = vadd.f32 %v2223_v5, %v1849_v7  ;;  %v2229_v5 = vld [vmem:[%s3013_s0] ss:$0 sm:$0xff]  ;;  %s2290_s0 = scalar_lea.hbm %s2967_s23, 16 }
 0x848   : > { %p2292_p1 = scmp.lt.s32.totalorder %s2290_s0, %s2286_s24 }
 0x849   : > { %v1854_v9 = vadd.f32 %v1853_v8, %v2760_v40  ;;  %v1889_v40 = vld [vmem:[%s2961_s17 + $0x10] sm:$0xff] }
 0x84a   : > { %1911 = vmatpush.msrb.mxu0 %v1889_v40  ;;  %p2293_p2 = por %p2292_p1, %p2291_p0 }
 0x84b   : > { %v1857_v10 = vsel %vm775_vm0, %v1854_v9, 0.0 }
 0x84c   : > { %1858 = vadd.xlane.f32.xlu0 %v1857_v10  ;;  %1912 = vmatpush.msrb.mxu0 %v1888_v18  ;;  %p2294_p3 = pnand %p2293_p2, %p2289_p13 }
 0x84e   : > { %1913 = vmatpush.msrb.mxu0 %v1887_v19 }
 0x8bf   : > { %v1859_v11 = vpop.xlane.xlu0 %1858 }
 0x8c0   : > { %v1860_v13 = vmul.f32 %v1859_v11, %v2648_v52 }
 0x8c2   : > { %v1861_v14 = vsub.f32 %v1854_v9, %v1860_v13 }
 0x8c4   : > { %v1862_v15 = vmul.f32 %v1861_v14, %v1861_v14 }
 0x8c6   : > { %v1863_v16 = vsel %vm775_vm0, %v1862_v15, 0.0 }
 0x8c7   : > { %1864 = vadd.xlane.f32.xlu2 %v1863_v16 }
 0x93a   : > { %v1865_v23 = vpop.xlane.xlu2 %1864 }
 0x93b   : > { %v1866_v24 = vmul.f32 %v1865_v23, %v2648_v52 }
 0x93d   : > { %v1867_v26 = vadd.f32 1e-05, %v1866_v24 }
 0x93f   : > { %2266 = vrsqrt.f32 %v1867_v26  ;;  %vm1874_vm7 = vweird.f32 %v1867_v26 }
 0x945   : > { %v2267_v28 = vpop.eup %2266 }
 0x946   : > { %v1869_v29 = vmul.f32 %v2267_v28, %v1867_v26  ;;  %vm1875_vm6 = vweird.f32 %v2267_v28 }
 0x947   : > { %vm1876_vm8 = vmor %vm1874_vm7, %vm1875_vm6 }
 0x948   : > { %v1870_v30 = vmul.f32 %v2267_v28, %v1869_v29 }
 0x94a   : > { %v1871_v31 = vmul.f32 0.5, %v1870_v30 }
 0x94c   : > { %v1872_v32 = vsub.f32 1.5, %v1871_v31 }
 0x94e   : > { %v1873_v33 = vmul.f32 %v2267_v28, %v1872_v32 }
 0x950   : > { %v1877_v35 = vsel %vm1876_vm8, %v2267_v28, %v1873_v33 }
 0x951   : > { %v1878_v36 = vmul.f32 %v1877_v35, %v1861_v14 }
 0x953   : > { %v1882_v38 = vmul.f32 %v2224_v34, %v1878_v36 }
 0x955   : > { %v1886_v39 = vadd.f32 %v2225_v37, %v1882_v38 }
 0x957   : > { %2140 = vmatmul.msk.f32.vlgmr.msrb.gmra.mxu0 %vm775_vm0, %v1886_v39 }
 0x9d4   : > { %v1915_v45 = vpop.f32.mrf.mxu0 }
 0x9d5   : > { %v1916_v46 = vadd.f32 %v2226_v44, %v1915_v45 }
 0x9d7   : > { %v1918_v47 = vmax.f32 %v1916_v46, 0.0 }
 0x9d9   : > { %2141 = vmatmul.msk.f32.vlgmr.msra.gmra.mxu1 %vm1931_vm9, %v1918_v47 }
 0xa56   : > { %v1952_v49 = vpop.f32.mrf.mxu1 }
 0xa57   : > { %v1953_v50 = vadd.f32 %v2227_v48, %v1952_v49 }
 0xa59   : > { %v1955_v51 = vadd.f32 %v1953_v50, %v1886_v39 }
 0xa5b   : > { %v1958_v53 = vsel %vm775_vm0, %v1955_v51, 0.0 }
 0xa5c   : > { %1959 = vadd.xlane.f32.xlu2 %v1958_v53 }
 0xacf   : > { %v1960_v54 = vpop.xlane.xlu2 %1959 }
 0xad0   : > { %v1961_v55 = vmul.f32 %v1960_v54, %v2648_v52 }
 0xad2   : > { %v1962_v12 = vsub.f32 %v1955_v51, %v1961_v55 }
 0xad4   : > { %v1963_v56 = vmul.f32 %v1962_v12, %v1962_v12 }
 0xad6   : > { %v1964_v57 = vsel %vm775_vm0, %v1963_v56, 0.0 }
 0xad7   : > { %1965 = vadd.xlane.f32.xlu2 %v1964_v57 }
 0xb4a   : > { %v1966_v58 = vpop.xlane.xlu2 %1965 }
 0xb4b   : > { %v1967_v59 = vmul.f32 %v1966_v58, %v2648_v52 }
 0xb4d   : > { %v1968_v60 = vadd.f32 1e-05, %v1967_v59 }
 0xb4f   : > { %2268 = vrsqrt.f32 %v1968_v60  ;;  %vm1975_vm11 = vweird.f32 %v1968_v60 }
 0xb55   : > { %v2269_v61 = vpop.eup %2268 }
 0xb56   : > { %v1970_v62 = vmul.f32 %v2269_v61, %v1968_v60  ;;  %vm1976_vm10 = vweird.f32 %v2269_v61 }
 0xb57   : > { %vm1977_vm12 = vmor %vm1975_vm11, %vm1976_vm10 }
 0xb58   : > { %v1971_v63 = vmul.f32 %v2269_v61, %v1970_v62 }
 0xb5a   : > { %v1972_v0 = vmul.f32 0.5, %v1971_v63 }
 0xb5c   : > { %v1973_v1 = vsub.f32 1.5, %v1972_v0 }
 0xb5e   : > { %v1974_v2 = vmul.f32 %v2269_v61, %v1973_v1 }
 0xb60   : > { %v1978_v52 = vsel %vm1977_vm12, %v2269_v61, %v1974_v2 }
 0xb61   : > { %v1979_v4 = vmul.f32 %v1978_v52, %v1962_v12 }
 0xb63   : > { %v1983_v6 = vmul.f32 %v2228_v3, %v1979_v4 }
 0xb65   : > { %v1987_v7 = vadd.f32 %v2229_v5, %v1983_v6 }
 0xb67   : > { %1988 = vst.msk [vmem:[%s727_s6] sm:$0xff] %vm775_vm0, %v1987_v7 }
 0xb68   : > { %2297 = shalt.err (!%p2294_p3)
}
 0xb69   : > { %2146 = dma.vmem_to_hbm [thread:$0]  (%p2495_p5), %s2003_s5, 128, %s2005_s8, %s1990_s28  }
 0xb6a PF: > { %s3014_s6 = sld [smem:[#allocation7_spill]] }
 0xb6b   : > { %s3015_s4 = sld [smem:[#allocation5_spill]] }
 0xb70   : > { %p2152_p4 = scmp.ge.s32.totalorder %s3014_s6, 2 }
 0xb71   : > { %s2016_s26 = sand.u32 1, %s3015_s4  }
 0xb72   : > { %p2149_p7 = pnand %p2152_p4, %p2499_p6  ;;  %s2017_s22 = scalar_lea.sflag [#allocation3], %s2016_s26 }
 0xb74   : > { %p2150_p8 = pneg %p2149_p7 }
 0xb76   : > { %2315 = dma.done.wait (%p2150_p8), %s2017_s22, 128  }
 0xb77   : > { %2317 = vsyncadd (%p2150_p8), %s2017_s22, 4294967168  ;;  %s3017_s25 = sld [smem:[#allocation8_spill]]  ;;  %s3020_s4 = smov %s2324_s30 }
 0xb78   : > { %s3018_s3 = sld [smem:[#allocation6_spill]] }
 0xb79   : > { %s3019_s24 = sld [smem:[#allocation9_spill]] }
 0xb7d   : > { %p33_p9 = scmp.ge.s32.totalorder %s3017_s25, 4  }
 0xb7e   : > { %s3021_s30 = smov %s3018_s3 }
 0xb7f   :  { %35 = sbr.rel (!%p33_p9) target bundleno = 14 (0xe), region = 153 }
 0xb84   :  { %2023 = vsyncpa [#allocation3], 1 }
 0xb85   :  { %2025 = vsyncpa [#allocation3 + $0x1], 1 }

</bundles_post_ra>
